<compile_context>
chip_gen: v7x
topology: tpu7x:2x2x1
jax: 0.10.0
libtpu: 0.0.40
codegen_flags: <defaults>
</compile_context>

<pallas_src>
import functools

import jax
import jax.numpy as jnp
from jax import lax
from jax.experimental import pallas as pl
from jax.experimental.pallas import tpu as pltpu


def crf_kernel(logits_ref, tags_ref, mask_ref, trans_ref, e_ref, cm_ref,
               start_ref, end_ref, out_ref, *, use_mxu):
    S, T, B = logits_ref.shape

    cm_col = cm_ref[...]          # (T, 1)  colmax of transitions (by next tag)
    start = start_ref[...]        # (T, 1)
    end = end_ref[...]            # (T, 1)

    tag_iota = lax.broadcasted_iota(jnp.int32, (T, B), 0)   # tag id on sublanes

    if use_mxu:
        # (next, prev) orientation: contractions over prev run on the MXU.
        rec_w = e_ref[...]                                   # (Tn, Tp) = E.T
        gold_w = trans_ref[...]                              # (Tn, Tp) = trans.T
    else:
        # (prev, next) orientation; hoist the lane-broadcast to (Tp, Tn, B) once
        # (the time loop is unrolled and JAX does not CSE broadcast_in_dim).
        rec_w = jnp.broadcast_to(e_ref[...][:, :, None], (T, T, B))
        gold_w = jnp.broadcast_to(trans_ref[...][:, :, None], (T, T, B))

    # ---- timestep 0 ----
    logits0 = logits_ref[0]                                  # (T, B)
    tags0 = tags_ref[pl.ds(0, 1), :]                         # (1, B) int32
    oh0 = tag_iota == tags0                                  # (T, B) bool
    alpha0 = start + logits0                                 # (T, B)
    acc0 = jnp.where(oh0, start, 0.0)                        # start[tags[0]] (deferred reduce)

    def step(i, carry):
        alpha, acc = carry
        li = logits_ref[i]                                   # (T, B)
        mi = mask_ref[pl.ds(i, 1), :]                        # (1, B) f32
        ti = tags_ref[pl.ds(i, 1), :]                        # (1, B) i32
        pm = mask_ref[pl.ds(i - 1, 1), :]                    # (1, B)
        pt = tags_ref[pl.ds(i - 1, 1), :]                    # (1, B)
        prev_logits = logits_ref[i - 1]                      # (T, B)

        mi_b = mi != 0.0
        pm_b = pm != 0.0
        oh_i = tag_iota == ti                                # (T, B) bool
        prev_oh = tag_iota == pt                             # (T, B) bool

        # ---- log-denominator recurrence (scaled-prob space, exp(trans) hoisted) ----
        am = jnp.max(alpha, axis=0, keepdims=True)           # (1, B)
        p = jnp.exp(alpha - am)                              # (T, B) -- only EUP push
        if use_mxu:
            s = jnp.dot(rec_w, p, preferred_element_type=jnp.float32)      # (Tn, B)
        else:
            s = jnp.sum(rec_w * p[:, None, :], axis=0)                     # (Tn, B), VPU
        new_alpha = am + cm_col + jnp.log(s) + li            # emission hoisted out of lse
        alpha = jnp.where(mi_b, new_alpha, alpha)

        # ---- gold-path score: per-step one-hot gathers, reduction deferred ----
        if use_mxu:
            trans_row = jnp.dot(gold_w, prev_oh.astype(jnp.float32),
                                preferred_element_type=jnp.float32)        # (Tn, B)
        else:
            trans_row = jnp.sum(jnp.where(prev_oh[:, None, :], gold_w, 0.0), axis=0)
        acc = (acc
               + jnp.where(jnp.logical_and(mi_b, oh_i), trans_row, 0.0)
               + jnp.where(jnp.logical_and(pm_b, prev_oh), prev_logits, 0.0))
        return alpha, acc

    unroll = True if S <= 16 else 8
    alpha, acc = lax.fori_loop(1, S, step, (alpha0, acc0), unroll=unroll)

    # ---- finalize denominator ----
    stops = alpha + end                                      # (T, B)
    mx = jnp.max(stops, axis=0, keepdims=True)               # (1, B)
    log_denom = mx + jnp.log(jnp.sum(jnp.exp(stops - mx), axis=0, keepdims=True))

    # ---- end-of-sequence terms for numerator ----
    maskf = mask_ref[...]                                    # (S, B)
    last_idx = jnp.sum(maskf, axis=0, keepdims=True).astype(jnp.int32) - 1   # (1, B)
    seq_iota = lax.broadcasted_iota(jnp.int32, (S, B), 0)
    last_sel = seq_iota == last_idx                          # (S, B) bool
    tagsf = tags_ref[...].astype(jnp.float32)
    last_tags = jnp.sum(jnp.where(last_sel, tagsf, 0.0),
                        axis=0, keepdims=True).astype(jnp.int32)             # (1, B)
    last_oh = tag_iota == last_tags                          # (T, B)

    last_trans = jnp.sum(jnp.where(last_oh, end, 0.0), axis=0, keepdims=True)
    last_input = jnp.sum(jnp.where(last_oh, logits_ref[S - 1], 0.0),
                         axis=0, keepdims=True)
    mask_last_b = mask_ref[pl.ds(S - 1, 1), :] != 0.0

    score = jnp.sum(acc, axis=0, keepdims=True)              # single deferred sublane reduce
    score = score + last_trans + jnp.where(mask_last_b, last_input, 0.0)

    # mask[0] == 0 only for wrapper batch padding (real rows have mask[:,0]==1).
    valid_b = mask_ref[pl.ds(0, 1), :] != 0.0
    out_ref[...] = jnp.where(valid_b, score - log_denom, 0.0)


def _round_up(x, m):
    return ((x + m - 1) // m) * m


def _pick_b_blk(B, S, T, use_mxu):
    # Approx f32 bytes per batch-lane: double-buffered logits + tags + mask
    # blocks, hoisted (T,T,B) broadcasts (VPU path only) and alpha/acc temps.
    per_lane = 4 * (2 * S * T + 4 * S + (0 if use_mxu else 2 * T * T) + 8 * T)
    budget = 24 * 1024 * 1024           # fits v5e/v6e/v7x scoped VMEM with margin
    max_blk = max(128, (budget // per_lane) // 128 * 128)

    Bp = _round_up(B, 128)
    if Bp <= 128:
        blk = 128
    elif Bp <= 1024:
        blk = _round_up(Bp // 2, 128)   # >= 2 blocks so both v7x TCs get work
    else:
        blk = 512
    return max(128, min(blk, max_blk))


def crf_forward(logits, tags, mask, transitions, start_transitions,
                end_transitions, *, b_blk=None):
    """Returns scalar: sum over batch of (joint log-likelihood - partition)."""
    logits = jnp.asarray(logits, jnp.float32)
    tags = jnp.asarray(tags, jnp.int32)
    maskf = jnp.asarray(mask, jnp.float32)
    B, S, T = logits.shape

    use_mxu = T >= 32
    if b_blk is None:
        b_blk = _pick_b_blk(B, S, T, use_mxu)
    Bp = _round_up(B, b_blk)
    pad = Bp - B

    # Batch-on-lanes layout.
    # TODO(synk): accept time-major (S,T,B) logits from the producer to avoid
    # this extra HBM pass over the dominant tensor.
    logits_t = jnp.transpose(logits, (1, 2, 0))        # (S, T, B)
    tags_t = jnp.transpose(tags, (1, 0))               # (S, B)
    mask_t = jnp.transpose(maskf, (1, 0))              # (S, B)
    if pad:
        logits_t = jnp.pad(logits_t, ((0, 0), (0, 0), (0, pad)))
        tags_t = jnp.pad(tags_t, ((0, 0), (0, pad)))
        mask_t = jnp.pad(mask_t, ((0, 0), (0, pad)))

    # Tiny parameter preprocessing (done once; hoists the transition exp out of
    # the kernel's unrolled time loop).
    trans = jnp.asarray(transitions, jnp.float32)                        # (Tp, Tn)
    cm = jnp.max(trans, axis=0)                                          # (Tn,)
    e_mat = jnp.exp(trans - cm[None, :])                                 # (Tp, Tn)
    cm_col = cm.reshape(T, 1)
    start2d = jnp.asarray(start_transitions, jnp.float32).reshape(T, 1)
    end2d = jnp.asarray(end_transitions, jnp.float32).reshape(T, 1)
    if use_mxu:
        trans_k = trans.T                                                # (Tn, Tp)
        e_k = e_mat.T
    else:
        trans_k = trans
        e_k = e_mat

    # Explicit VMEM budget (don't rely on the default scoped limit, esp. v5e).
    block_in_bytes = 4 * b_blk * (S * T + 2 * S)
    temp_bytes = 4 * b_blk * ((0 if use_mxu else 2 * T * T) + 8 * T)
    needed = 2 * block_in_bytes + temp_bytes + 4 * (2 * T * T + 3 * T) + 8 * b_blk
    vmem_limit = int(min(64 * 1024 * 1024, max(needed + (4 << 20), 16 << 20)))

    grid = (Bp // b_blk,)
    kernel = functools.partial(crf_kernel, use_mxu=use_mxu)
    out = pl.pallas_call(
        kernel,
        out_shape=jax.ShapeDtypeStruct((1, Bp), jnp.float32),
        grid_spec=pltpu.PrefetchScalarGridSpec(
            num_scalar_prefetch=0,
            grid=grid,
            in_specs=[
                pl.BlockSpec((S, T, b_blk), lambda b: (0, 0, b)),   # logits
                pl.BlockSpec((S, b_blk), lambda b: (0, b)),         # tags
                pl.BlockSpec((S, b_blk), lambda b: (0, b)),         # mask
                pl.BlockSpec((T, T), lambda b: (0, 0)),             # transitions (orient. per path)
                pl.BlockSpec((T, T), lambda b: (0, 0)),             # exp(trans - colmax)
                pl.BlockSpec((T, 1), lambda b: (0, 0)),             # colmax
                pl.BlockSpec((T, 1), lambda b: (0, 0)),             # start
                pl.BlockSpec((T, 1), lambda b: (0, 0)),             # end
            ],
            out_specs=pl.BlockSpec((1, b_blk), lambda b: (0, b)),
        ),
        compiler_params=pltpu.CompilerParams(
            dimension_semantics=("parallel",),
            vmem_limit_bytes=vmem_limit,
        ),
    )(logits_t, tags_t, mask_t, trans_k, e_k, cm_col, start2d, end2d)
    return jnp.sum(out)


def crf_forward_ref(logits, tags, mask, trans, start, end):
    """Pure-JAX reference mirroring the PyTorch module (for validation)."""
    logits = logits.astype(jnp.float32)
    maskf = mask.astype(jnp.float32)
    B, S, T = logits.shape
    # partition
    alpha = start[None, :] + logits[:, 0, :]
    for i in range(1, S):
        inner = alpha[:, :, None] + logits[:, i, None, :] + trans[None, :, :]
        new_alpha = jax.scipy.special.logsumexp(inner, axis=1)
        mi = maskf[:, i][:, None]
        alpha = new_alpha * mi + alpha * (1.0 - mi)
    log_denom = jax.scipy.special.logsumexp(alpha + end[None, :], axis=1)
    # gold path score
    score = start[tags[:, 0]]
    for i in range(S - 1):
        cur, nxt = tags[:, i], tags[:, i + 1]
        trans_s = trans[cur, nxt]
        emit_s = jnp.take_along_axis(logits[:, i, :], cur[:, None], axis=1)[:, 0]
        score = score + trans_s * maskf[:, i + 1] + emit_s * maskf[:, i]
    last_idx = jnp.sum(mask.astype(jnp.int32), axis=1) - 1
    last_tags = jnp.take_along_axis(tags, last_idx[:, None], axis=1)[:, 0]
    last_trans = end[last_tags]
    last_input = jnp.take_along_axis(logits[:, S - 1, :], last_tags[:, None], axis=1)[:, 0]
    score = score + last_trans + last_input * maskf[:, S - 1]
    return jnp.sum(score - log_denom)


if __name__ == "__main__":
    B, S, T = 2, 8, 8  # batch, seq_len, num_tags

    key = jax.random.PRNGKey(0)
    k_logit, k_tag, k_trans, k_start, k_end = jax.random.split(key, 5)

    # Deterministic parameter init (shapes from __init__):
    #   transitions: (T, T) xavier_normal -> std = sqrt(2/(T+T))
    #   start/end transitions: (T,) standard normal
    xavier_std = (2.0 / (T + T)) ** 0.5
    transitions = jax.random.normal(k_trans, (T, T), jnp.float32) * xavier_std
    start_transitions = jax.random.normal(k_start, (T,), jnp.float32)
    end_transitions = jax.random.normal(k_end, (T,), jnp.float32)

    # Example inputs
    logits = jax.random.normal(k_logit, (B, S, T), jnp.float32)
    tags = jax.random.randint(k_tag, (B, S), 0, T, jnp.int32)
    # left-aligned mask (second sequence is shorter)
    mask = jnp.array(
        [[1, 1, 1, 1, 1, 1, 1, 1],
         [1, 1, 1, 1, 1, 0, 0, 0]], dtype=jnp.int32)

    out = crf_forward(logits, tags, mask, transitions, start_transitions, end_transitions)
    out = jax.block_until_ready(out)

    ref = crf_forward_ref(logits, tags, mask, transitions, start_transitions, end_transitions)
    assert jnp.allclose(out, ref, rtol=1e-3, atol=1e-3), (out, ref)

    print("KERNEL_OK")
</pallas_src>

<mosaic_0001>
module attributes {stable_mosaic.version = 11 : i64} {
  func.func @crf_kernel(%arg0: i32, %arg1: memref<8x8x128xf32, #tpu.memory_space<vmem>>, %arg2: memref<8x128xi32, #tpu.memory_space<vmem>>, %arg3: memref<8x128xf32, #tpu.memory_space<vmem>>, %arg4: memref<8x8xf32, #tpu.memory_space<vmem>>, %arg5: memref<8x8xf32, #tpu.memory_space<vmem>>, %arg6: memref<8x1xf32, #tpu.memory_space<vmem>>, %arg7: memref<8x1xf32, #tpu.memory_space<vmem>>, %arg8: memref<8x1xf32, #tpu.memory_space<vmem>>, %arg9: memref<1x128xf32, #tpu.memory_space<vmem>>) attributes {dimension_semantics = [#tpu.dimension_semantics<parallel>], iteration_bounds = array<i64: 1>, scalar_prefetch = 0 : i64, scratch_operands = 0 : i64, tpu.core_type = #tpu.core_type<tc>, window_params = [{transform_indices = @transform_0, window_bounds = array<i64: 8, 8, 128>}, {transform_indices = @transform_1, window_bounds = array<i64: 8, 128>}, {transform_indices = @transform_2, window_bounds = array<i64: 8, 128>}, {pipeline_mode = #tpu.pipeline_mode<synchronous>, transform_indices = @transform_3, window_bounds = array<i64: 8, 8>}, {pipeline_mode = #tpu.pipeline_mode<synchronous>, transform_indices = @transform_4, window_bounds = array<i64: 8, 8>}, {pipeline_mode = #tpu.pipeline_mode<synchronous>, transform_indices = @transform_5, window_bounds = array<i64: 8, 1>}, {pipeline_mode = #tpu.pipeline_mode<synchronous>, transform_indices = @transform_6, window_bounds = array<i64: 8, 1>}, {pipeline_mode = #tpu.pipeline_mode<synchronous>, transform_indices = @transform_7, window_bounds = array<i64: 8, 1>}, {transform_indices = @transform_8, window_bounds = array<i64: 1, 128>}]} {
    %c0 = arith.constant 0 : index
    %c0_0 = arith.constant 0 : index
    %0 = vector.load %arg6[%c0, %c0_0] : memref<8x1xf32, #tpu.memory_space<vmem>>, vector<8x1xf32>
    %c0_1 = arith.constant 0 : index
    %c0_2 = arith.constant 0 : index
    %1 = vector.load %arg7[%c0_1, %c0_2] : memref<8x1xf32, #tpu.memory_space<vmem>>, vector<8x1xf32>
    %c0_3 = arith.constant 0 : index
    %c0_4 = arith.constant 0 : index
    %2 = vector.load %arg8[%c0_3, %c0_4] : memref<8x1xf32, #tpu.memory_space<vmem>>, vector<8x1xf32>
    %3 = tpu.iota {dimensions = array<i32: 0>} : vector<8x128xi32>
    %c0_5 = arith.constant 0 : index
    %c0_6 = arith.constant 0 : index
    %4 = vector.load %arg5[%c0_5, %c0_6] : memref<8x8xf32, #tpu.memory_space<vmem>>, vector<8x8xf32>
    %5 = vector.shape_cast %4 : vector<8x8xf32> to vector<8x8x1xf32>
    %6 = vector.shape_cast %5 : vector<8x8x1xf32> to vector<8x8x1xf32>
    %7 = vector.broadcast %6 : vector<8x8x1xf32> to vector<8x8x128xf32>
    %c0_7 = arith.constant 0 : index
    %c0_8 = arith.constant 0 : index
    %8 = vector.load %arg4[%c0_7, %c0_8] : memref<8x8xf32, #tpu.memory_space<vmem>>, vector<8x8xf32>
    %9 = vector.shape_cast %8 : vector<8x8xf32> to vector<8x8x1xf32>
    %10 = vector.shape_cast %9 : vector<8x8x1xf32> to vector<8x8x1xf32>
    %11 = vector.broadcast %10 : vector<8x8x1xf32> to vector<8x8x128xf32>
    %c0_9 = arith.constant 0 : index
    %c0_10 = arith.constant 0 : index
    %c0_11 = arith.constant 0 : index
    %12 = vector.load %arg1[%c0_9, %c0_10, %c0_11] : memref<8x8x128xf32, #tpu.memory_space<vmem>>, vector<1x8x128xf32>
    %13 = vector.shape_cast %12 : vector<1x8x128xf32> to vector<8x128xf32>
    %c0_12 = arith.constant 0 : index
    %c0_13 = arith.constant 0 : index
    %14 = vector.load %arg2[%c0_12, %c0_13] : memref<8x128xi32, #tpu.memory_space<vmem>>, vector<1x128xi32>
    %15 = vector.broadcast %14 : vector<1x128xi32> to vector<8x128xi32>
    %16 = arith.cmpi eq, %3, %15 : vector<8x128xi32>
    %17 = vector.broadcast %1 : vector<8x1xf32> to vector<8x128xf32>
    %18 = arith.addf %17, %13 : vector<8x128xf32>
    %cst = arith.constant 0.000000e+00 : f32
    %19 = vector.shape_cast %1 : vector<8x1xf32> to vector<8x1xf32>
    %20 = vector.broadcast %19 : vector<8x1xf32> to vector<8x128xf32>
    %21 = vector.broadcast %cst : f32 to vector<8x128xf32>
    %22 = arith.select %16, %20, %21 : vector<8x128xi1>, vector<8x128xf32>
    %c1_i32 = arith.constant 1 : i32
    %23 = arith.index_cast %c1_i32 : i32 to index
    %c0_14 = arith.constant 0 : index
    %c0_15 = arith.constant 0 : index
    %24 = vector.load %arg1[%23, %c0_14, %c0_15] : memref<8x8x128xf32, #tpu.memory_space<vmem>>, vector<1x8x128xf32>
    %25 = vector.shape_cast %24 : vector<1x8x128xf32> to vector<8x128xf32>
    %26 = arith.index_cast %c1_i32 : i32 to index
    %c0_16 = arith.constant 0 : index
    %27 = vector.load %arg3[%26, %c0_16] : memref<8x128xf32, #tpu.memory_space<vmem>>, vector<1x128xf32>
    %28 = arith.index_cast %c1_i32 : i32 to index
    %c0_17 = arith.constant 0 : index
    %29 = vector.load %arg2[%28, %c0_17] : memref<8x128xi32, #tpu.memory_space<vmem>>, vector<1x128xi32>
    %c1_i32_18 = arith.constant 1 : i32
    %30 = arith.subi %c1_i32, %c1_i32_18 : i32
    %31 = arith.index_cast %30 : i32 to index
    %c0_19 = arith.constant 0 : index
    %32 = vector.load %arg3[%31, %c0_19] : memref<8x128xf32, #tpu.memory_space<vmem>>, vector<1x128xf32>
    %c1_i32_20 = arith.constant 1 : i32
    %33 = arith.subi %c1_i32, %c1_i32_20 : i32
    %34 = arith.index_cast %33 : i32 to index
    %c0_21 = arith.constant 0 : index
    %35 = vector.load %arg2[%34, %c0_21] : memref<8x128xi32, #tpu.memory_space<vmem>>, vector<1x128xi32>
    %c1_i32_22 = arith.constant 1 : i32
    %36 = arith.subi %c1_i32, %c1_i32_22 : i32
    %37 = arith.index_cast %36 : i32 to index
    %c0_23 = arith.constant 0 : index
    %c0_24 = arith.constant 0 : index
    %38 = vector.load %arg1[%37, %c0_23, %c0_24] : memref<8x8x128xf32, #tpu.memory_space<vmem>>, vector<1x8x128xf32>
    %39 = vector.shape_cast %38 : vector<1x8x128xf32> to vector<8x128xf32>
    %cst_25 = arith.constant 0.000000e+00 : f32
    %40 = vector.broadcast %cst_25 : f32 to vector<1x128xf32>
    %41 = arith.cmpf one, %27, %40 : vector<1x128xf32>
    %cst_26 = arith.constant 0.000000e+00 : f32
    %42 = vector.broadcast %cst_26 : f32 to vector<1x128xf32>
    %43 = arith.cmpf one, %32, %42 : vector<1x128xf32>
    %44 = vector.broadcast %29 : vector<1x128xi32> to vector<8x128xi32>
    %45 = arith.cmpi eq, %3, %44 : vector<8x128xi32>
    %46 = vector.broadcast %35 : vector<1x128xi32> to vector<8x128xi32>
    %47 = arith.cmpi eq, %3, %46 : vector<8x128xi32>
    %cst_27 = arith.constant dense<0xFF800000> : vector<128xf32>
    %48 = vector.multi_reduction <maximumf>, %18, %cst_27 [0] : vector<8x128xf32> to vector<128xf32>
    %49 = vector.shape_cast %48 : vector<128xf32> to vector<1x128xf32>
    %50 = vector.broadcast %49 : vector<1x128xf32> to vector<8x128xf32>
    %51 = arith.subf %18, %50 : vector<8x128xf32>
    %52 = math.exp %51 : vector<8x128xf32>
    %53 = vector.shape_cast %52 : vector<8x128xf32> to vector<8x1x128xf32>
    %54 = vector.broadcast %53 : vector<8x1x128xf32> to vector<8x8x128xf32>
    %55 = arith.mulf %7, %54 : vector<8x8x128xf32>
    %cst_28 = arith.constant dense<0.000000e+00> : vector<8x128xf32>
    %56 = vector.multi_reduction <add>, %55, %cst_28 [0] : vector<8x8x128xf32> to vector<8x128xf32>
    %57 = vector.broadcast %49 : vector<1x128xf32> to vector<8x128xf32>
    %58 = vector.broadcast %0 : vector<8x1xf32> to vector<8x128xf32>
    %59 = arith.addf %57, %58 : vector<8x128xf32>
    %60 = math.log %56 : vector<8x128xf32>
    %61 = arith.addf %59, %60 : vector<8x128xf32>
    %62 = arith.addf %61, %25 : vector<8x128xf32>
    %63 = vector.shape_cast %41 : vector<1x128xi1> to vector<1x128xi1>
    %64 = vector.broadcast %63 : vector<1x128xi1> to vector<8x128xi1>
    %65 = arith.select %64, %62, %18 : vector<8x128xi1>, vector<8x128xf32>
    %66 = vector.shape_cast %47 : vector<8x128xi1> to vector<8x1x128xi1>
    %cst_29 = arith.constant 0.000000e+00 : f32
    %67 = vector.shape_cast %66 : vector<8x1x128xi1> to vector<8x1x128xi1>
    %68 = vector.broadcast %67 : vector<8x1x128xi1> to vector<8x8x128xi1>
    %69 = vector.broadcast %cst_29 : f32 to vector<8x8x128xf32>
    %70 = arith.select %68, %11, %69 : vector<8x8x128xi1>, vector<8x8x128xf32>
    %cst_30 = arith.constant dense<0.000000e+00> : vector<8x128xf32>
    %71 = vector.multi_reduction <add>, %70, %cst_30 [0] : vector<8x8x128xf32> to vector<8x128xf32>
    %72 = vector.broadcast %41 : vector<1x128xi1> to vector<8x128xi1>
    %73 = arith.andi %72, %45 : vector<8x128xi1>
    %cst_31 = arith.constant 0.000000e+00 : f32
    %74 = vector.broadcast %cst_31 : f32 to vector<8x128xf32>
    %75 = arith.select %73, %71, %74 : vector<8x128xi1>, vector<8x128xf32>
    %76 = arith.addf %22, %75 : vector<8x128xf32>
    %77 = vector.broadcast %43 : vector<1x128xi1> to vector<8x128xi1>
    %78 = arith.andi %77, %47 : vector<8x128xi1>
    %cst_32 = arith.constant 0.000000e+00 : f32
    %79 = vector.broadcast %cst_32 : f32 to vector<8x128xf32>
    %80 = arith.select %78, %39, %79 : vector<8x128xi1>, vector<8x128xf32>
    %81 = arith.addf %76, %80 : vector<8x128xf32>
    %c2_i32 = arith.constant 2 : i32
    %82 = arith.index_cast %c2_i32 : i32 to index
    %c0_33 = arith.constant 0 : index
    %c0_34 = arith.constant 0 : index
    %83 = vector.load %arg1[%82, %c0_33, %c0_34] : memref<8x8x128xf32, #tpu.memory_space<vmem>>, vector<1x8x128xf32>
    %84 = vector.shape_cast %83 : vector<1x8x128xf32> to vector<8x128xf32>
    %85 = arith.index_cast %c2_i32 : i32 to index
    %c0_35 = arith.constant 0 : index
    %86 = vector.load %arg3[%85, %c0_35] : memref<8x128xf32, #tpu.memory_space<vmem>>, vector<1x128xf32>
    %87 = arith.index_cast %c2_i32 : i32 to index
    %c0_36 = arith.constant 0 : index
    %88 = vector.load %arg2[%87, %c0_36] : memref<8x128xi32, #tpu.memory_space<vmem>>, vector<1x128xi32>
    %c1_i32_37 = arith.constant 1 : i32
    %89 = arith.subi %c2_i32, %c1_i32_37 : i32
    %90 = arith.index_cast %89 : i32 to index
    %c0_38 = arith.constant 0 : index
    %91 = vector.load %arg3[%90, %c0_38] : memref<8x128xf32, #tpu.memory_space<vmem>>, vector<1x128xf32>
    %c1_i32_39 = arith.constant 1 : i32
    %92 = arith.subi %c2_i32, %c1_i32_39 : i32
    %93 = arith.index_cast %92 : i32 to index
    %c0_40 = arith.constant 0 : index
    %94 = vector.load %arg2[%93, %c0_40] : memref<8x128xi32, #tpu.memory_space<vmem>>, vector<1x128xi32>
    %c1_i32_41 = arith.constant 1 : i32
    %95 = arith.subi %c2_i32, %c1_i32_41 : i32
    %96 = arith.index_cast %95 : i32 to index
    %c0_42 = arith.constant 0 : index
    %c0_43 = arith.constant 0 : index
    %97 = vector.load %arg1[%96, %c0_42, %c0_43] : memref<8x8x128xf32, #tpu.memory_space<vmem>>, vector<1x8x128xf32>
    %98 = vector.shape_cast %97 : vector<1x8x128xf32> to vector<8x128xf32>
    %cst_44 = arith.constant 0.000000e+00 : f32
    %99 = vector.broadcast %cst_44 : f32 to vector<1x128xf32>
    %100 = arith.cmpf one, %86, %99 : vector<1x128xf32>
    %cst_45 = arith.constant 0.000000e+00 : f32
    %101 = vector.broadcast %cst_45 : f32 to vector<1x128xf32>
    %102 = arith.cmpf one, %91, %101 : vector<1x128xf32>
    %103 = vector.broadcast %88 : vector<1x128xi32> to vector<8x128xi32>
    %104 = arith.cmpi eq, %3, %103 : vector<8x128xi32>
    %105 = vector.broadcast %94 : vector<1x128xi32> to vector<8x128xi32>
    %106 = arith.cmpi eq, %3, %105 : vector<8x128xi32>
    %cst_46 = arith.constant dense<0xFF800000> : vector<128xf32>
    %107 = vector.multi_reduction <maximumf>, %65, %cst_46 [0] : vector<8x128xf32> to vector<128xf32>
    %108 = vector.shape_cast %107 : vector<128xf32> to vector<1x128xf32>
    %109 = vector.broadcast %108 : vector<1x128xf32> to vector<8x128xf32>
    %110 = arith.subf %65, %109 : vector<8x128xf32>
    %111 = math.exp %110 : vector<8x128xf32>
    %112 = vector.shape_cast %111 : vector<8x128xf32> to vector<8x1x128xf32>
    %113 = vector.broadcast %112 : vector<8x1x128xf32> to vector<8x8x128xf32>
    %114 = arith.mulf %7, %113 : vector<8x8x128xf32>
    %cst_47 = arith.constant dense<0.000000e+00> : vector<8x128xf32>
    %115 = vector.multi_reduction <add>, %114, %cst_47 [0] : vector<8x8x128xf32> to vector<8x128xf32>
    %116 = vector.broadcast %108 : vector<1x128xf32> to vector<8x128xf32>
    %117 = vector.broadcast %0 : vector<8x1xf32> to vector<8x128xf32>
    %118 = arith.addf %116, %117 : vector<8x128xf32>
    %119 = math.log %115 : vector<8x128xf32>
    %120 = arith.addf %118, %119 : vector<8x128xf32>
    %121 = arith.addf %120, %84 : vector<8x128xf32>
    %122 = vector.shape_cast %100 : vector<1x128xi1> to vector<1x128xi1>
    %123 = vector.broadcast %122 : vector<1x128xi1> to vector<8x128xi1>
    %124 = arith.select %123, %121, %65 : vector<8x128xi1>, vector<8x128xf32>
    %125 = vector.shape_cast %106 : vector<8x128xi1> to vector<8x1x128xi1>
    %cst_48 = arith.constant 0.000000e+00 : f32
    %126 = vector.shape_cast %125 : vector<8x1x128xi1> to vector<8x1x128xi1>
    %127 = vector.broadcast %126 : vector<8x1x128xi1> to vector<8x8x128xi1>
    %128 = vector.broadcast %cst_48 : f32 to vector<8x8x128xf32>
    %129 = arith.select %127, %11, %128 : vector<8x8x128xi1>, vector<8x8x128xf32>
    %cst_49 = arith.constant dense<0.000000e+00> : vector<8x128xf32>
    %130 = vector.multi_reduction <add>, %129, %cst_49 [0] : vector<8x8x128xf32> to vector<8x128xf32>
    %131 = vector.broadcast %100 : vector<1x128xi1> to vector<8x128xi1>
    %132 = arith.andi %131, %104 : vector<8x128xi1>
    %cst_50 = arith.constant 0.000000e+00 : f32
    %133 = vector.broadcast %cst_50 : f32 to vector<8x128xf32>
    %134 = arith.select %132, %130, %133 : vector<8x128xi1>, vector<8x128xf32>
    %135 = arith.addf %81, %134 : vector<8x128xf32>
    %136 = vector.broadcast %102 : vector<1x128xi1> to vector<8x128xi1>
    %137 = arith.andi %136, %106 : vector<8x128xi1>
    %cst_51 = arith.constant 0.000000e+00 : f32
    %138 = vector.broadcast %cst_51 : f32 to vector<8x128xf32>
    %139 = arith.select %137, %98, %138 : vector<8x128xi1>, vector<8x128xf32>
    %140 = arith.addf %135, %139 : vector<8x128xf32>
    %c3_i32 = arith.constant 3 : i32
    %141 = arith.index_cast %c3_i32 : i32 to index
    %c0_52 = arith.constant 0 : index
    %c0_53 = arith.constant 0 : index
    %142 = vector.load %arg1[%141, %c0_52, %c0_53] : memref<8x8x128xf32, #tpu.memory_space<vmem>>, vector<1x8x128xf32>
    %143 = vector.shape_cast %142 : vector<1x8x128xf32> to vector<8x128xf32>
    %144 = arith.index_cast %c3_i32 : i32 to index
    %c0_54 = arith.constant 0 : index
    %145 = vector.load %arg3[%144, %c0_54] : memref<8x128xf32, #tpu.memory_space<vmem>>, vector<1x128xf32>
    %146 = arith.index_cast %c3_i32 : i32 to index
    %c0_55 = arith.constant 0 : index
    %147 = vector.load %arg2[%146, %c0_55] : memref<8x128xi32, #tpu.memory_space<vmem>>, vector<1x128xi32>
    %c1_i32_56 = arith.constant 1 : i32
    %148 = arith.subi %c3_i32, %c1_i32_56 : i32
    %149 = arith.index_cast %148 : i32 to index
    %c0_57 = arith.constant 0 : index
    %150 = vector.load %arg3[%149, %c0_57] : memref<8x128xf32, #tpu.memory_space<vmem>>, vector<1x128xf32>
    %c1_i32_58 = arith.constant 1 : i32
    %151 = arith.subi %c3_i32, %c1_i32_58 : i32
    %152 = arith.index_cast %151 : i32 to index
    %c0_59 = arith.constant 0 : index
    %153 = vector.load %arg2[%152, %c0_59] : memref<8x128xi32, #tpu.memory_space<vmem>>, vector<1x128xi32>
    %c1_i32_60 = arith.constant 1 : i32
    %154 = arith.subi %c3_i32, %c1_i32_60 : i32
    %155 = arith.index_cast %154 : i32 to index
    %c0_61 = arith.constant 0 : index
    %c0_62 = arith.constant 0 : index
    %156 = vector.load %arg1[%155, %c0_61, %c0_62] : memref<8x8x128xf32, #tpu.memory_space<vmem>>, vector<1x8x128xf32>
    %157 = vector.shape_cast %156 : vector<1x8x128xf32> to vector<8x128xf32>
    %cst_63 = arith.constant 0.000000e+00 : f32
    %158 = vector.broadcast %cst_63 : f32 to vector<1x128xf32>
    %159 = arith.cmpf one, %145, %158 : vector<1x128xf32>
    %cst_64 = arith.constant 0.000000e+00 : f32
    %160 = vector.broadcast %cst_64 : f32 to vector<1x128xf32>
    %161 = arith.cmpf one, %150, %160 : vector<1x128xf32>
    %162 = vector.broadcast %147 : vector<1x128xi32> to vector<8x128xi32>
    %163 = arith.cmpi eq, %3, %162 : vector<8x128xi32>
    %164 = vector.broadcast %153 : vector<1x128xi32> to vector<8x128xi32>
    %165 = arith.cmpi eq, %3, %164 : vector<8x128xi32>
    %cst_65 = arith.constant dense<0xFF800000> : vector<128xf32>
    %166 = vector.multi_reduction <maximumf>, %124, %cst_65 [0] : vector<8x128xf32> to vector<128xf32>
    %167 = vector.shape_cast %166 : vector<128xf32> to vector<1x128xf32>
    %168 = vector.broadcast %167 : vector<1x128xf32> to vector<8x128xf32>
    %169 = arith.subf %124, %168 : vector<8x128xf32>
    %170 = math.exp %169 : vector<8x128xf32>
    %171 = vector.shape_cast %170 : vector<8x128xf32> to vector<8x1x128xf32>
    %172 = vector.broadcast %171 : vector<8x1x128xf32> to vector<8x8x128xf32>
    %173 = arith.mulf %7, %172 : vector<8x8x128xf32>
    %cst_66 = arith.constant dense<0.000000e+00> : vector<8x128xf32>
    %174 = vector.multi_reduction <add>, %173, %cst_66 [0] : vector<8x8x128xf32> to vector<8x128xf32>
    %175 = vector.broadcast %167 : vector<1x128xf32> to vector<8x128xf32>
    %176 = vector.broadcast %0 : vector<8x1xf32> to vector<8x128xf32>
    %177 = arith.addf %175, %176 : vector<8x128xf32>
    %178 = math.log %174 : vector<8x128xf32>
    %179 = arith.addf %177, %178 : vector<8x128xf32>
    %180 = arith.addf %179, %143 : vector<8x128xf32>
    %181 = vector.shape_cast %159 : vector<1x128xi1> to vector<1x128xi1>
    %182 = vector.broadcast %181 : vector<1x128xi1> to vector<8x128xi1>
    %183 = arith.select %182, %180, %124 : vector<8x128xi1>, vector<8x128xf32>
    %184 = vector.shape_cast %165 : vector<8x128xi1> to vector<8x1x128xi1>
    %cst_67 = arith.constant 0.000000e+00 : f32
    %185 = vector.shape_cast %184 : vector<8x1x128xi1> to vector<8x1x128xi1>
    %186 = vector.broadcast %185 : vector<8x1x128xi1> to vector<8x8x128xi1>
    %187 = vector.broadcast %cst_67 : f32 to vector<8x8x128xf32>
    %188 = arith.select %186, %11, %187 : vector<8x8x128xi1>, vector<8x8x128xf32>
    %cst_68 = arith.constant dense<0.000000e+00> : vector<8x128xf32>
    %189 = vector.multi_reduction <add>, %188, %cst_68 [0] : vector<8x8x128xf32> to vector<8x128xf32>
    %190 = vector.broadcast %159 : vector<1x128xi1> to vector<8x128xi1>
    %191 = arith.andi %190, %163 : vector<8x128xi1>
    %cst_69 = arith.constant 0.000000e+00 : f32
    %192 = vector.broadcast %cst_69 : f32 to vector<8x128xf32>
    %193 = arith.select %191, %189, %192 : vector<8x128xi1>, vector<8x128xf32>
    %194 = arith.addf %140, %193 : vector<8x128xf32>
    %195 = vector.broadcast %161 : vector<1x128xi1> to vector<8x128xi1>
    %196 = arith.andi %195, %165 : vector<8x128xi1>
    %cst_70 = arith.constant 0.000000e+00 : f32
    %197 = vector.broadcast %cst_70 : f32 to vector<8x128xf32>
    %198 = arith.select %196, %157, %197 : vector<8x128xi1>, vector<8x128xf32>
    %199 = arith.addf %194, %198 : vector<8x128xf32>
    %c4_i32 = arith.constant 4 : i32
    %200 = arith.index_cast %c4_i32 : i32 to index
    %c0_71 = arith.constant 0 : index
    %c0_72 = arith.constant 0 : index
    %201 = vector.load %arg1[%200, %c0_71, %c0_72] : memref<8x8x128xf32, #tpu.memory_space<vmem>>, vector<1x8x128xf32>
    %202 = vector.shape_cast %201 : vector<1x8x128xf32> to vector<8x128xf32>
    %203 = arith.index_cast %c4_i32 : i32 to index
    %c0_73 = arith.constant 0 : index
    %204 = vector.load %arg3[%203, %c0_73] : memref<8x128xf32, #tpu.memory_space<vmem>>, vector<1x128xf32>
    %205 = arith.index_cast %c4_i32 : i32 to index
    %c0_74 = arith.constant 0 : index
    %206 = vector.load %arg2[%205, %c0_74] : memref<8x128xi32, #tpu.memory_space<vmem>>, vector<1x128xi32>
    %c1_i32_75 = arith.constant 1 : i32
    %207 = arith.subi %c4_i32, %c1_i32_75 : i32
    %208 = arith.index_cast %207 : i32 to index
    %c0_76 = arith.constant 0 : index
    %209 = vector.load %arg3[%208, %c0_76] : memref<8x128xf32, #tpu.memory_space<vmem>>, vector<1x128xf32>
    %c1_i32_77 = arith.constant 1 : i32
    %210 = arith.subi %c4_i32, %c1_i32_77 : i32
    %211 = arith.index_cast %210 : i32 to index
    %c0_78 = arith.constant 0 : index
    %212 = vector.load %arg2[%211, %c0_78] : memref<8x128xi32, #tpu.memory_space<vmem>>, vector<1x128xi32>
    %c1_i32_79 = arith.constant 1 : i32
    %213 = arith.subi %c4_i32, %c1_i32_79 : i32
    %214 = arith.index_cast %213 : i32 to index
    %c0_80 = arith.constant 0 : index
    %c0_81 = arith.constant 0 : index
    %215 = vector.load %arg1[%214, %c0_80, %c0_81] : memref<8x8x128xf32, #tpu.memory_space<vmem>>, vector<1x8x128xf32>
    %216 = vector.shape_cast %215 : vector<1x8x128xf32> to vector<8x128xf32>
    %cst_82 = arith.constant 0.000000e+00 : f32
    %217 = vector.broadcast %cst_82 : f32 to vector<1x128xf32>
    %218 = arith.cmpf one, %204, %217 : vector<1x128xf32>
    %cst_83 = arith.constant 0.000000e+00 : f32
    %219 = vector.broadcast %cst_83 : f32 to vector<1x128xf32>
    %220 = arith.cmpf one, %209, %219 : vector<1x128xf32>
    %221 = vector.broadcast %206 : vector<1x128xi32> to vector<8x128xi32>
    %222 = arith.cmpi eq, %3, %221 : vector<8x128xi32>
    %223 = vector.broadcast %212 : vector<1x128xi32> to vector<8x128xi32>
    %224 = arith.cmpi eq, %3, %223 : vector<8x128xi32>
    %cst_84 = arith.constant dense<0xFF800000> : vector<128xf32>
    %225 = vector.multi_reduction <maximumf>, %183, %cst_84 [0] : vector<8x128xf32> to vector<128xf32>
    %226 = vector.shape_cast %225 : vector<128xf32> to vector<1x128xf32>
    %227 = vector.broadcast %226 : vector<1x128xf32> to vector<8x128xf32>
    %228 = arith.subf %183, %227 : vector<8x128xf32>
    %229 = math.exp %228 : vector<8x128xf32>
    %230 = vector.shape_cast %229 : vector<8x128xf32> to vector<8x1x128xf32>
    %231 = vector.broadcast %230 : vector<8x1x128xf32> to vector<8x8x128xf32>
    %232 = arith.mulf %7, %231 : vector<8x8x128xf32>
    %cst_85 = arith.constant dense<0.000000e+00> : vector<8x128xf32>
    %233 = vector.multi_reduction <add>, %232, %cst_85 [0] : vector<8x8x128xf32> to vector<8x128xf32>
    %234 = vector.broadcast %226 : vector<1x128xf32> to vector<8x128xf32>
    %235 = vector.broadcast %0 : vector<8x1xf32> to vector<8x128xf32>
    %236 = arith.addf %234, %235 : vector<8x128xf32>
    %237 = math.log %233 : vector<8x128xf32>
    %238 = arith.addf %236, %237 : vector<8x128xf32>
    %239 = arith.addf %238, %202 : vector<8x128xf32>
    %240 = vector.shape_cast %218 : vector<1x128xi1> to vector<1x128xi1>
    %241 = vector.broadcast %240 : vector<1x128xi1> to vector<8x128xi1>
    %242 = arith.select %241, %239, %183 : vector<8x128xi1>, vector<8x128xf32>
    %243 = vector.shape_cast %224 : vector<8x128xi1> to vector<8x1x128xi1>
    %cst_86 = arith.constant 0.000000e+00 : f32
    %244 = vector.shape_cast %243 : vector<8x1x128xi1> to vector<8x1x128xi1>
    %245 = vector.broadcast %244 : vector<8x1x128xi1> to vector<8x8x128xi1>
    %246 = vector.broadcast %cst_86 : f32 to vector<8x8x128xf32>
    %247 = arith.select %245, %11, %246 : vector<8x8x128xi1>, vector<8x8x128xf32>
    %cst_87 = arith.constant dense<0.000000e+00> : vector<8x128xf32>
    %248 = vector.multi_reduction <add>, %247, %cst_87 [0] : vector<8x8x128xf32> to vector<8x128xf32>
    %249 = vector.broadcast %218 : vector<1x128xi1> to vector<8x128xi1>
    %250 = arith.andi %249, %222 : vector<8x128xi1>
    %cst_88 = arith.constant 0.000000e+00 : f32
    %251 = vector.broadcast %cst_88 : f32 to vector<8x128xf32>
    %252 = arith.select %250, %248, %251 : vector<8x128xi1>, vector<8x128xf32>
    %253 = arith.addf %199, %252 : vector<8x128xf32>
    %254 = vector.broadcast %220 : vector<1x128xi1> to vector<8x128xi1>
    %255 = arith.andi %254, %224 : vector<8x128xi1>
    %cst_89 = arith.constant 0.000000e+00 : f32
    %256 = vector.broadcast %cst_89 : f32 to vector<8x128xf32>
    %257 = arith.select %255, %216, %256 : vector<8x128xi1>, vector<8x128xf32>
    %258 = arith.addf %253, %257 : vector<8x128xf32>
    %c5_i32 = arith.constant 5 : i32
    %259 = arith.index_cast %c5_i32 : i32 to index
    %c0_90 = arith.constant 0 : index
    %c0_91 = arith.constant 0 : index
    %260 = vector.load %arg1[%259, %c0_90, %c0_91] : memref<8x8x128xf32, #tpu.memory_space<vmem>>, vector<1x8x128xf32>
    %261 = vector.shape_cast %260 : vector<1x8x128xf32> to vector<8x128xf32>
    %262 = arith.index_cast %c5_i32 : i32 to index
    %c0_92 = arith.constant 0 : index
    %263 = vector.load %arg3[%262, %c0_92] : memref<8x128xf32, #tpu.memory_space<vmem>>, vector<1x128xf32>
    %264 = arith.index_cast %c5_i32 : i32 to index
    %c0_93 = arith.constant 0 : index
    %265 = vector.load %arg2[%264, %c0_93] : memref<8x128xi32, #tpu.memory_space<vmem>>, vector<1x128xi32>
    %c1_i32_94 = arith.constant 1 : i32
    %266 = arith.subi %c5_i32, %c1_i32_94 : i32
    %267 = arith.index_cast %266 : i32 to index
    %c0_95 = arith.constant 0 : index
    %268 = vector.load %arg3[%267, %c0_95] : memref<8x128xf32, #tpu.memory_space<vmem>>, vector<1x128xf32>
    %c1_i32_96 = arith.constant 1 : i32
    %269 = arith.subi %c5_i32, %c1_i32_96 : i32
    %270 = arith.index_cast %269 : i32 to index
    %c0_97 = arith.constant 0 : index
    %271 = vector.load %arg2[%270, %c0_97] : memref<8x128xi32, #tpu.memory_space<vmem>>, vector<1x128xi32>
    %c1_i32_98 = arith.constant 1 : i32
    %272 = arith.subi %c5_i32, %c1_i32_98 : i32
    %273 = arith.index_cast %272 : i32 to index
    %c0_99 = arith.constant 0 : index
    %c0_100 = arith.constant 0 : index
    %274 = vector.load %arg1[%273, %c0_99, %c0_100] : memref<8x8x128xf32, #tpu.memory_space<vmem>>, vector<1x8x128xf32>
    %275 = vector.shape_cast %274 : vector<1x8x128xf32> to vector<8x128xf32>
    %cst_101 = arith.constant 0.000000e+00 : f32
    %276 = vector.broadcast %cst_101 : f32 to vector<1x128xf32>
    %277 = arith.cmpf one, %263, %276 : vector<1x128xf32>
    %cst_102 = arith.constant 0.000000e+00 : f32
    %278 = vector.broadcast %cst_102 : f32 to vector<1x128xf32>
    %279 = arith.cmpf one, %268, %278 : vector<1x128xf32>
    %280 = vector.broadcast %265 : vector<1x128xi32> to vector<8x128xi32>
    %281 = arith.cmpi eq, %3, %280 : vector<8x128xi32>
    %282 = vector.broadcast %271 : vector<1x128xi32> to vector<8x128xi32>
    %283 = arith.cmpi eq, %3, %282 : vector<8x128xi32>
    %cst_103 = arith.constant dense<0xFF800000> : vector<128xf32>
    %284 = vector.multi_reduction <maximumf>, %242, %cst_103 [0] : vector<8x128xf32> to vector<128xf32>
    %285 = vector.shape_cast %284 : vector<128xf32> to vector<1x128xf32>
    %286 = vector.broadcast %285 : vector<1x128xf32> to vector<8x128xf32>
    %287 = arith.subf %242, %286 : vector<8x128xf32>
    %288 = math.exp %287 : vector<8x128xf32>
    %289 = vector.shape_cast %288 : vector<8x128xf32> to vector<8x1x128xf32>
    %290 = vector.broadcast %289 : vector<8x1x128xf32> to vector<8x8x128xf32>
    %291 = arith.mulf %7, %290 : vector<8x8x128xf32>
    %cst_104 = arith.constant dense<0.000000e+00> : vector<8x128xf32>
    %292 = vector.multi_reduction <add>, %291, %cst_104 [0] : vector<8x8x128xf32> to vector<8x128xf32>
    %293 = vector.broadcast %285 : vector<1x128xf32> to vector<8x128xf32>
    %294 = vector.broadcast %0 : vector<8x1xf32> to vector<8x128xf32>
    %295 = arith.addf %293, %294 : vector<8x128xf32>
    %296 = math.log %292 : vector<8x128xf32>
    %297 = arith.addf %295, %296 : vector<8x128xf32>
    %298 = arith.addf %297, %261 : vector<8x128xf32>
    %299 = vector.shape_cast %277 : vector<1x128xi1> to vector<1x128xi1>
    %300 = vector.broadcast %299 : vector<1x128xi1> to vector<8x128xi1>
    %301 = arith.select %300, %298, %242 : vector<8x128xi1>, vector<8x128xf32>
    %302 = vector.shape_cast %283 : vector<8x128xi1> to vector<8x1x128xi1>
    %cst_105 = arith.constant 0.000000e+00 : f32
    %303 = vector.shape_cast %302 : vector<8x1x128xi1> to vector<8x1x128xi1>
    %304 = vector.broadcast %303 : vector<8x1x128xi1> to vector<8x8x128xi1>
    %305 = vector.broadcast %cst_105 : f32 to vector<8x8x128xf32>
    %306 = arith.select %304, %11, %305 : vector<8x8x128xi1>, vector<8x8x128xf32>
    %cst_106 = arith.constant dense<0.000000e+00> : vector<8x128xf32>
    %307 = vector.multi_reduction <add>, %306, %cst_106 [0] : vector<8x8x128xf32> to vector<8x128xf32>
    %308 = vector.broadcast %277 : vector<1x128xi1> to vector<8x128xi1>
    %309 = arith.andi %308, %281 : vector<8x128xi1>
    %cst_107 = arith.constant 0.000000e+00 : f32
    %310 = vector.broadcast %cst_107 : f32 to vector<8x128xf32>
    %311 = arith.select %309, %307, %310 : vector<8x128xi1>, vector<8x128xf32>
    %312 = arith.addf %258, %311 : vector<8x128xf32>
    %313 = vector.broadcast %279 : vector<1x128xi1> to vector<8x128xi1>
    %314 = arith.andi %313, %283 : vector<8x128xi1>
    %cst_108 = arith.constant 0.000000e+00 : f32
    %315 = vector.broadcast %cst_108 : f32 to vector<8x128xf32>
    %316 = arith.select %314, %275, %315 : vector<8x128xi1>, vector<8x128xf32>
    %317 = arith.addf %312, %316 : vector<8x128xf32>
    %c6_i32 = arith.constant 6 : i32
    %318 = arith.index_cast %c6_i32 : i32 to index
    %c0_109 = arith.constant 0 : index
    %c0_110 = arith.constant 0 : index
    %319 = vector.load %arg1[%318, %c0_109, %c0_110] : memref<8x8x128xf32, #tpu.memory_space<vmem>>, vector<1x8x128xf32>
    %320 = vector.shape_cast %319 : vector<1x8x128xf32> to vector<8x128xf32>
    %321 = arith.index_cast %c6_i32 : i32 to index
    %c0_111 = arith.constant 0 : index
    %322 = vector.load %arg3[%321, %c0_111] : memref<8x128xf32, #tpu.memory_space<vmem>>, vector<1x128xf32>
    %323 = arith.index_cast %c6_i32 : i32 to index
    %c0_112 = arith.constant 0 : index
    %324 = vector.load %arg2[%323, %c0_112] : memref<8x128xi32, #tpu.memory_space<vmem>>, vector<1x128xi32>
    %c1_i32_113 = arith.constant 1 : i32
    %325 = arith.subi %c6_i32, %c1_i32_113 : i32
    %326 = arith.index_cast %325 : i32 to index
    %c0_114 = arith.constant 0 : index
    %327 = vector.load %arg3[%326, %c0_114] : memref<8x128xf32, #tpu.memory_space<vmem>>, vector<1x128xf32>
    %c1_i32_115 = arith.constant 1 : i32
    %328 = arith.subi %c6_i32, %c1_i32_115 : i32
    %329 = arith.index_cast %328 : i32 to index
    %c0_116 = arith.constant 0 : index
    %330 = vector.load %arg2[%329, %c0_116] : memref<8x128xi32, #tpu.memory_space<vmem>>, vector<1x128xi32>
    %c1_i32_117 = arith.constant 1 : i32
    %331 = arith.subi %c6_i32, %c1_i32_117 : i32
    %332 = arith.index_cast %331 : i32 to index
    %c0_118 = arith.constant 0 : index
    %c0_119 = arith.constant 0 : index
    %333 = vector.load %arg1[%332, %c0_118, %c0_119] : memref<8x8x128xf32, #tpu.memory_space<vmem>>, vector<1x8x128xf32>
    %334 = vector.shape_cast %333 : vector<1x8x128xf32> to vector<8x128xf32>
    %cst_120 = arith.constant 0.000000e+00 : f32
    %335 = vector.broadcast %cst_120 : f32 to vector<1x128xf32>
    %336 = arith.cmpf one, %322, %335 : vector<1x128xf32>
    %cst_121 = arith.constant 0.000000e+00 : f32
    %337 = vector.broadcast %cst_121 : f32 to vector<1x128xf32>
    %338 = arith.cmpf one, %327, %337 : vector<1x128xf32>
    %339 = vector.broadcast %324 : vector<1x128xi32> to vector<8x128xi32>
    %340 = arith.cmpi eq, %3, %339 : vector<8x128xi32>
    %341 = vector.broadcast %330 : vector<1x128xi32> to vector<8x128xi32>
    %342 = arith.cmpi eq, %3, %341 : vector<8x128xi32>
    %cst_122 = arith.constant dense<0xFF800000> : vector<128xf32>
    %343 = vector.multi_reduction <maximumf>, %301, %cst_122 [0] : vector<8x128xf32> to vector<128xf32>
    %344 = vector.shape_cast %343 : vector<128xf32> to vector<1x128xf32>
    %345 = vector.broadcast %344 : vector<1x128xf32> to vector<8x128xf32>
    %346 = arith.subf %301, %345 : vector<8x128xf32>
    %347 = math.exp %346 : vector<8x128xf32>
    %348 = vector.shape_cast %347 : vector<8x128xf32> to vector<8x1x128xf32>
    %349 = vector.broadcast %348 : vector<8x1x128xf32> to vector<8x8x128xf32>
    %350 = arith.mulf %7, %349 : vector<8x8x128xf32>
    %cst_123 = arith.constant dense<0.000000e+00> : vector<8x128xf32>
    %351 = vector.multi_reduction <add>, %350, %cst_123 [0] : vector<8x8x128xf32> to vector<8x128xf32>
    %352 = vector.broadcast %344 : vector<1x128xf32> to vector<8x128xf32>
    %353 = vector.broadcast %0 : vector<8x1xf32> to vector<8x128xf32>
    %354 = arith.addf %352, %353 : vector<8x128xf32>
    %355 = math.log %351 : vector<8x128xf32>
    %356 = arith.addf %354, %355 : vector<8x128xf32>
    %357 = arith.addf %356, %320 : vector<8x128xf32>
    %358 = vector.shape_cast %336 : vector<1x128xi1> to vector<1x128xi1>
    %359 = vector.broadcast %358 : vector<1x128xi1> to vector<8x128xi1>
    %360 = arith.select %359, %357, %301 : vector<8x128xi1>, vector<8x128xf32>
    %361 = vector.shape_cast %342 : vector<8x128xi1> to vector<8x1x128xi1>
    %cst_124 = arith.constant 0.000000e+00 : f32
    %362 = vector.shape_cast %361 : vector<8x1x128xi1> to vector<8x1x128xi1>
    %363 = vector.broadcast %362 : vector<8x1x128xi1> to vector<8x8x128xi1>
    %364 = vector.broadcast %cst_124 : f32 to vector<8x8x128xf32>
    %365 = arith.select %363, %11, %364 : vector<8x8x128xi1>, vector<8x8x128xf32>
    %cst_125 = arith.constant dense<0.000000e+00> : vector<8x128xf32>
    %366 = vector.multi_reduction <add>, %365, %cst_125 [0] : vector<8x8x128xf32> to vector<8x128xf32>
    %367 = vector.broadcast %336 : vector<1x128xi1> to vector<8x128xi1>
    %368 = arith.andi %367, %340 : vector<8x128xi1>
    %cst_126 = arith.constant 0.000000e+00 : f32
    %369 = vector.broadcast %cst_126 : f32 to vector<8x128xf32>
    %370 = arith.select %368, %366, %369 : vector<8x128xi1>, vector<8x128xf32>
    %371 = arith.addf %317, %370 : vector<8x128xf32>
    %372 = vector.broadcast %338 : vector<1x128xi1> to vector<8x128xi1>
    %373 = arith.andi %372, %342 : vector<8x128xi1>
    %cst_127 = arith.constant 0.000000e+00 : f32
    %374 = vector.broadcast %cst_127 : f32 to vector<8x128xf32>
    %375 = arith.select %373, %334, %374 : vector<8x128xi1>, vector<8x128xf32>
    %376 = arith.addf %371, %375 : vector<8x128xf32>
    %c7_i32 = arith.constant 7 : i32
    %377 = arith.index_cast %c7_i32 : i32 to index
    %c0_128 = arith.constant 0 : index
    %c0_129 = arith.constant 0 : index
    %378 = vector.load %arg1[%377, %c0_128, %c0_129] : memref<8x8x128xf32, #tpu.memory_space<vmem>>, vector<1x8x128xf32>
    %379 = vector.shape_cast %378 : vector<1x8x128xf32> to vector<8x128xf32>
    %380 = arith.index_cast %c7_i32 : i32 to index
    %c0_130 = arith.constant 0 : index
    %381 = vector.load %arg3[%380, %c0_130] : memref<8x128xf32, #tpu.memory_space<vmem>>, vector<1x128xf32>
    %382 = arith.index_cast %c7_i32 : i32 to index
    %c0_131 = arith.constant 0 : index
    %383 = vector.load %arg2[%382, %c0_131] : memref<8x128xi32, #tpu.memory_space<vmem>>, vector<1x128xi32>
    %c1_i32_132 = arith.constant 1 : i32
    %384 = arith.subi %c7_i32, %c1_i32_132 : i32
    %385 = arith.index_cast %384 : i32 to index
    %c0_133 = arith.constant 0 : index
    %386 = vector.load %arg3[%385, %c0_133] : memref<8x128xf32, #tpu.memory_space<vmem>>, vector<1x128xf32>
    %c1_i32_134 = arith.constant 1 : i32
    %387 = arith.subi %c7_i32, %c1_i32_134 : i32
    %388 = arith.index_cast %387 : i32 to index
    %c0_135 = arith.constant 0 : index
    %389 = vector.load %arg2[%388, %c0_135] : memref<8x128xi32, #tpu.memory_space<vmem>>, vector<1x128xi32>
    %c1_i32_136 = arith.constant 1 : i32
    %390 = arith.subi %c7_i32, %c1_i32_136 : i32
    %391 = arith.index_cast %390 : i32 to index
    %c0_137 = arith.constant 0 : index
    %c0_138 = arith.constant 0 : index
    %392 = vector.load %arg1[%391, %c0_137, %c0_138] : memref<8x8x128xf32, #tpu.memory_space<vmem>>, vector<1x8x128xf32>
    %393 = vector.shape_cast %392 : vector<1x8x128xf32> to vector<8x128xf32>
    %cst_139 = arith.constant 0.000000e+00 : f32
    %394 = vector.broadcast %cst_139 : f32 to vector<1x128xf32>
    %395 = arith.cmpf one, %381, %394 : vector<1x128xf32>
    %cst_140 = arith.constant 0.000000e+00 : f32
    %396 = vector.broadcast %cst_140 : f32 to vector<1x128xf32>
    %397 = arith.cmpf one, %386, %396 : vector<1x128xf32>
    %398 = vector.broadcast %383 : vector<1x128xi32> to vector<8x128xi32>
    %399 = arith.cmpi eq, %3, %398 : vector<8x128xi32>
    %400 = vector.broadcast %389 : vector<1x128xi32> to vector<8x128xi32>
    %401 = arith.cmpi eq, %3, %400 : vector<8x128xi32>
    %cst_141 = arith.constant dense<0xFF800000> : vector<128xf32>
    %402 = vector.multi_reduction <maximumf>, %360, %cst_141 [0] : vector<8x128xf32> to vector<128xf32>
    %403 = vector.shape_cast %402 : vector<128xf32> to vector<1x128xf32>
    %404 = vector.broadcast %403 : vector<1x128xf32> to vector<8x128xf32>
    %405 = arith.subf %360, %404 : vector<8x128xf32>
    %406 = math.exp %405 : vector<8x128xf32>
    %407 = vector.shape_cast %406 : vector<8x128xf32> to vector<8x1x128xf32>
    %408 = vector.broadcast %407 : vector<8x1x128xf32> to vector<8x8x128xf32>
    %409 = arith.mulf %7, %408 : vector<8x8x128xf32>
    %cst_142 = arith.constant dense<0.000000e+00> : vector<8x128xf32>
    %410 = vector.multi_reduction <add>, %409, %cst_142 [0] : vector<8x8x128xf32> to vector<8x128xf32>
    %411 = vector.broadcast %403 : vector<1x128xf32> to vector<8x128xf32>
    %412 = vector.broadcast %0 : vector<8x1xf32> to vector<8x128xf32>
    %413 = arith.addf %411, %412 : vector<8x128xf32>
    %414 = math.log %410 : vector<8x128xf32>
    %415 = arith.addf %413, %414 : vector<8x128xf32>
    %416 = arith.addf %415, %379 : vector<8x128xf32>
    %417 = vector.shape_cast %395 : vector<1x128xi1> to vector<1x128xi1>
    %418 = vector.broadcast %417 : vector<1x128xi1> to vector<8x128xi1>
    %419 = arith.select %418, %416, %360 : vector<8x128xi1>, vector<8x128xf32>
    %420 = vector.shape_cast %401 : vector<8x128xi1> to vector<8x1x128xi1>
    %cst_143 = arith.constant 0.000000e+00 : f32
    %421 = vector.shape_cast %420 : vector<8x1x128xi1> to vector<8x1x128xi1>
    %422 = vector.broadcast %421 : vector<8x1x128xi1> to vector<8x8x128xi1>
    %423 = vector.broadcast %cst_143 : f32 to vector<8x8x128xf32>
    %424 = arith.select %422, %11, %423 : vector<8x8x128xi1>, vector<8x8x128xf32>
    %cst_144 = arith.constant dense<0.000000e+00> : vector<8x128xf32>
    %425 = vector.multi_reduction <add>, %424, %cst_144 [0] : vector<8x8x128xf32> to vector<8x128xf32>
    %426 = vector.broadcast %395 : vector<1x128xi1> to vector<8x128xi1>
    %427 = arith.andi %426, %399 : vector<8x128xi1>
    %cst_145 = arith.constant 0.000000e+00 : f32
    %428 = vector.broadcast %cst_145 : f32 to vector<8x128xf32>
    %429 = arith.select %427, %425, %428 : vector<8x128xi1>, vector<8x128xf32>
    %430 = arith.addf %376, %429 : vector<8x128xf32>
    %431 = vector.broadcast %397 : vector<1x128xi1> to vector<8x128xi1>
    %432 = arith.andi %431, %401 : vector<8x128xi1>
    %cst_146 = arith.constant 0.000000e+00 : f32
    %433 = vector.broadcast %cst_146 : f32 to vector<8x128xf32>
    %434 = arith.select %432, %393, %433 : vector<8x128xi1>, vector<8x128xf32>
    %435 = arith.addf %430, %434 : vector<8x128xf32>
    %c7_i32_147 = arith.constant 7 : i32
    %436 = vector.broadcast %2 : vector<8x1xf32> to vector<8x128xf32>
    %437 = arith.addf %419, %436 : vector<8x128xf32>
    %cst_148 = arith.constant dense<0xFF800000> : vector<128xf32>
    %438 = vector.multi_reduction <maximumf>, %437, %cst_148 [0] : vector<8x128xf32> to vector<128xf32>
    %439 = vector.shape_cast %438 : vector<128xf32> to vector<1x128xf32>
    %440 = vector.broadcast %439 : vector<1x128xf32> to vector<8x128xf32>
    %441 = arith.subf %437, %440 : vector<8x128xf32>
    %442 = math.exp %441 : vector<8x128xf32>
    %cst_149 = arith.constant dense<0.000000e+00> : vector<128xf32>
    %443 = vector.multi_reduction <add>, %442, %cst_149 [0] : vector<8x128xf32> to vector<128xf32>
    %444 = vector.shape_cast %443 : vector<128xf32> to vector<1x128xf32>
    %445 = math.log %444 : vector<1x128xf32>
    %446 = arith.addf %439, %445 : vector<1x128xf32>
    %c0_150 = arith.constant 0 : index
    %c0_151 = arith.constant 0 : index
    %447 = vector.load %arg3[%c0_150, %c0_151] : memref<8x128xf32, #tpu.memory_space<vmem>>, vector<8x128xf32>
    %cst_152 = arith.constant dense<0.000000e+00> : vector<128xf32>
    %448 = vector.multi_reduction <add>, %447, %cst_152 [0] : vector<8x128xf32> to vector<128xf32>
    %449 = vector.shape_cast %448 : vector<128xf32> to vector<1x128xf32>
    %450 = arith.fptosi %449 : vector<1x128xf32> to vector<1x128xi32>
    %c1_i32_153 = arith.constant 1 : i32
    %451 = vector.broadcast %c1_i32_153 : i32 to vector<1x128xi32>
    %452 = arith.subi %450, %451 : vector<1x128xi32>
    %453 = tpu.iota {dimensions = array<i32: 0>} : vector<8x128xi32>
    %454 = vector.broadcast %452 : vector<1x128xi32> to vector<8x128xi32>
    %455 = arith.cmpi eq, %453, %454 : vector<8x128xi32>
    %c0_154 = arith.constant 0 : index
    %c0_155 = arith.constant 0 : index
    %456 = vector.load %arg2[%c0_154, %c0_155] : memref<8x128xi32, #tpu.memory_space<vmem>>, vector<8x128xi32>
    %457 = arith.sitofp %456 : vector<8x128xi32> to vector<8x128xf32>
    %cst_156 = arith.constant 0.000000e+00 : f32
    %458 = vector.broadcast %cst_156 : f32 to vector<8x128xf32>
    %459 = arith.select %455, %457, %458 : vector<8x128xi1>, vector<8x128xf32>
    %cst_157 = arith.constant dense<0.000000e+00> : vector<128xf32>
    %460 = vector.multi_reduction <add>, %459, %cst_157 [0] : vector<8x128xf32> to vector<128xf32>
    %461 = vector.shape_cast %460 : vector<128xf32> to vector<1x128xf32>
    %462 = arith.fptosi %461 : vector<1x128xf32> to vector<1x128xi32>
    %463 = vector.broadcast %462 : vector<1x128xi32> to vector<8x128xi32>
    %464 = arith.cmpi eq, %3, %463 : vector<8x128xi32>
    %cst_158 = arith.constant 0.000000e+00 : f32
    %465 = vector.shape_cast %2 : vector<8x1xf32> to vector<8x1xf32>
    %466 = vector.broadcast %465 : vector<8x1xf32> to vector<8x128xf32>
    %467 = vector.broadcast %cst_158 : f32 to vector<8x128xf32>
    %468 = arith.select %464, %466, %467 : vector<8x128xi1>, vector<8x128xf32>
    %cst_159 = arith.constant dense<0.000000e+00> : vector<128xf32>
    %469 = vector.multi_reduction <add>, %468, %cst_159 [0] : vector<8x128xf32> to vector<128xf32>
    %470 = vector.shape_cast %469 : vector<128xf32> to vector<1x128xf32>
    %c7 = arith.constant 7 : index
    %c0_160 = arith.constant 0 : index
    %c0_161 = arith.constant 0 : index
    %471 = vector.load %arg1[%c7, %c0_160, %c0_161] : memref<8x8x128xf32, #tpu.memory_space<vmem>>, vector<1x8x128xf32>
    %472 = vector.shape_cast %471 : vector<1x8x128xf32> to vector<8x128xf32>
    %cst_162 = arith.constant 0.000000e+00 : f32
    %473 = vector.broadcast %cst_162 : f32 to vector<8x128xf32>
    %474 = arith.select %464, %472, %473 : vector<8x128xi1>, vector<8x128xf32>
    %cst_163 = arith.constant dense<0.000000e+00> : vector<128xf32>
    %475 = vector.multi_reduction <add>, %474, %cst_163 [0] : vector<8x128xf32> to vector<128xf32>
    %476 = vector.shape_cast %475 : vector<128xf32> to vector<1x128xf32>
    %c7_164 = arith.constant 7 : index
    %c0_165 = arith.constant 0 : index
    %477 = vector.load %arg3[%c7_164, %c0_165] : memref<8x128xf32, #tpu.memory_space<vmem>>, vector<1x128xf32>
    %cst_166 = arith.constant 0.000000e+00 : f32
    %478 = vector.broadcast %cst_166 : f32 to vector<1x128xf32>
    %479 = arith.cmpf one, %477, %478 : vector<1x128xf32>
    %cst_167 = arith.constant dense<0.000000e+00> : vector<128xf32>
    %480 = vector.multi_reduction <add>, %435, %cst_167 [0] : vector<8x128xf32> to vector<128xf32>
    %481 = vector.shape_cast %480 : vector<128xf32> to vector<1x128xf32>
    %482 = arith.addf %481, %470 : vector<1x128xf32>
    %cst_168 = arith.constant 0.000000e+00 : f32
    %483 = vector.broadcast %cst_168 : f32 to vector<1x128xf32>
    %484 = arith.select %479, %476, %483 : vector<1x128xi1>, vector<1x128xf32>
    %485 = arith.addf %482, %484 : vector<1x128xf32>
    %c0_169 = arith.constant 0 : index
    %c0_170 = arith.constant 0 : index
    %486 = vector.load %arg3[%c0_169, %c0_170] : memref<8x128xf32, #tpu.memory_space<vmem>>, vector<1x128xf32>
    %cst_171 = arith.constant 0.000000e+00 : f32
    %487 = vector.broadcast %cst_171 : f32 to vector<1x128xf32>
    %488 = arith.cmpf one, %486, %487 : vector<1x128xf32>
    %489 = arith.subf %485, %446 : vector<1x128xf32>
    %cst_172 = arith.constant 0.000000e+00 : f32
    %490 = vector.broadcast %cst_172 : f32 to vector<1x128xf32>
    %491 = arith.select %488, %489, %490 : vector<1x128xi1>, vector<1x128xf32>
    %c0_173 = arith.constant 0 : index
    %c0_174 = arith.constant 0 : index
    %492 = vector.load %arg9[%c0_173, %c0_174] : memref<1x128xf32, #tpu.memory_space<vmem>>, vector<1x128xf32>
    tpu.vector_store %arg9[%c0_173, %c0_174], %491 {strides = array<i32>} : memref<1x128xf32, #tpu.memory_space<vmem>>, vector<1x128xf32>,
    return
  }
  func.func @transform_0(%arg0: i32) -> (i32, i32, i32) {
    %c0_i32 = arith.constant 0 : i32
    %c0_i32_0 = arith.constant 0 : i32
    %c0_i32_1 = arith.constant 0 : i32
    return %c0_i32, %c0_i32_0, %arg0 : i32, i32, i32
  }
  func.func @transform_1(%arg0: i32) -> (i32, i32) {
    %c0_i32 = arith.constant 0 : i32
    %c0_i32_0 = arith.constant 0 : i32
    return %c0_i32, %arg0 : i32, i32
  }
  func.func @transform_2(%arg0: i32) -> (i32, i32) {
    %c0_i32 = arith.constant 0 : i32
    %c0_i32_0 = arith.constant 0 : i32
    return %c0_i32, %arg0 : i32, i32
  }
  func.func @transform_3(%arg0: i32) -> (i32, i32) {
    %c0_i32 = arith.constant 0 : i32
    %c0_i32_0 = arith.constant 0 : i32
    %c0_i32_1 = arith.constant 0 : i32
    return %c0_i32, %c0_i32_0 : i32, i32
  }
  func.func @transform_4(%arg0: i32) -> (i32, i32) {
    %c0_i32 = arith.constant 0 : i32
    %c0_i32_0 = arith.constant 0 : i32
    %c0_i32_1 = arith.constant 0 : i32
    return %c0_i32, %c0_i32_0 : i32, i32
  }
  func.func @transform_5(%arg0: i32) -> (i32, i32) {
    %c0_i32 = arith.constant 0 : i32
    %c0_i32_0 = arith.constant 0 : i32
    %c0_i32_1 = arith.constant 0 : i32
    return %c0_i32, %c0_i32_0 : i32, i32
  }
  func.func @transform_6(%arg0: i32) -> (i32, i32) {
    %c0_i32 = arith.constant 0 : i32
    %c0_i32_0 = arith.constant 0 : i32
    %c0_i32_1 = arith.constant 0 : i32
    return %c0_i32, %c0_i32_0 : i32, i32
  }
  func.func @transform_7(%arg0: i32) -> (i32, i32) {
    %c0_i32 = arith.constant 0 : i32
    %c0_i32_0 = arith.constant 0 : i32
    %c0_i32_1 = arith.constant 0 : i32
    return %c0_i32, %c0_i32_0 : i32, i32
  }
  func.func @transform_8(%arg0: i32) -> (i32, i32) {
    %c0_i32 = arith.constant 0 : i32
    %c0_i32_0 = arith.constant 0 : i32
    return %c0_i32, %arg0 : i32, i32
  }
}

</mosaic_0001>

<bundles_post_ra>
// kernel: tpu_custom_call.1
= control target key start
LH: loop header
LB: loop body
LE: loop exit
PB: predicated region body
PF: predicated region fallthrough
CT: control target
= control target key end

     0   :  { %13 = vsyncpa [#allocation3], 0  ;;  %s3964_s0 = inlined_call_operand.hbm [shape: f32[8,8,128], index: 0, kind: input, shape index: {}]   ;;  %s3965_s1 = inlined_call_operand.vmem [shape: s32[8,128], index: 1, kind: input, shape index: {}]   ;;  %s3966_s2 = inlined_call_operand.vmem [shape: f32[8,128], index: 2, kind: input, shape index: {}]   ;;  %s3967_s3 = inlined_call_operand.vmem [shape: f32[8,8], index: 3, kind: input, shape index: {}]   ;;  %s3968_s4 = inlined_call_operand.vmem [shape: f32[8,8], index: 4, kind: input, shape index: {}]   ;;  %s3969_s5 = inlined_call_operand.vmem [shape: f32[8,1], index: 5, kind: input, shape index: {}]   ;;  %s3970_s6 = inlined_call_operand.vmem [shape: f32[8,1], index: 6, kind: input, shape index: {}]   ;;  %s3971_s7 = inlined_call_operand.vmem [shape: f32[8,1], index: 7, kind: input, shape index: {}]   ;;  %s3972_s8 = inlined_call_operand.hbm [shape: f32[1,128], index: 8, kind: output, shape index: {}]  }
   0x1   :  { %14 = vsyncpa [#allocation4], 0  ;;  %s2217_s27 = smov [#allocation2]   ;;  %s2169_s9 = scalar_lea.hbm %s3964_s0, 1024 }
   0x2   :  { %s20_s28 = sshll.u32 %s2217_s27, 4  ;;  %p2170_p0 = scmp.ne.s32.totalorder %s3964_s0, %s2169_s9  ;;  %s21_s28 = int_to_ptr.vmem [resolvable:$true] %s20_s28 }
   0x3   :  { %p2173_p1 = scmp.lt.u32.totalorder %s2169_s9, %s3964_s0 }
   0x5   :  { %p2175_p2 = pnand %p2173_p1, %p2170_p0 }
   0x7   :  { %2178 = shalt.err (!%p2175_p2)
}
   0x8   :  { %s2179_s14 = scalar_lea.vmem %s21_s28, 1024  ;;  %p2184_p4 = scmp.lt.s32.totalorder %s21_s28, %s21_s28 }
   0x9   :  { %p2180_p3 = scmp.ne.s32.totalorder %s21_s28, %s2179_s14  ;;  %p2185_p5 = scmp.lt.s32.totalorder %s2179_s14, %s2179_s14 }
   0xb   :  { %p2186_p6 = por %p2185_p5, %p2184_p4 }
   0xd   :  { %p2187_p7 = pnand %p2186_p6, %p2180_p3 }
   0xf   :  { %2190 = shalt.err (!%p2187_p7)
}
  0x10   :  { %s2218_s15 = smov 128   ;;  %s2219_s16 = smov 8  }
  0x11   :  { %26 = dma.hbm_to_vmem [thread:$0]  %s3964_s0, 1024, %s21_s28, [#allocation3], %s2218_s15, %s2218_s15, %s2219_s16  }
  0x12   :  { %2213 = dma.done.wait [#allocation3], 1024  }
  0x13   :  { %2214 = vsyncadd [#allocation3], 4294966272  ;;  %v47_v0 = vlaneseq  ;;  %v3980_v1 = vmov 0   ;;  %v45_v6 = vld [vmem:[%s3970_s6] sm:$0xff]  ;;  %v2221_v43 = vmov 1966171168  }
  0x14   :  { %2130 = vset.pattern.permute.xlu0 %v3980_v1  ;;  %2131 = vset.pattern.permute.xlu1 %v3980_v1  ;;  %v49_v7 = vld [vmem:[%s3968_s4] sm:$0xff]  ;;  %v201_v44 = vunpack.c.l.s4 %v2221_v43  ;;  %v178_v43 = vld [vmem:[#allocation2 + $0x8] sm:$0xff] }
  0x15   :  { %v2282_v2 = vshrl.u32 %v47_v0, 7  ;;  %172 = vperm.xlu0 %2130, %v45_v6   ;;  %v44_v21 = vld [vmem:[%s3969_s5] sm:$0xff] }
  0x16   :  { %v106_v22 = vld [vmem:[%s3967_s3] sm:$0xff]  ;;  %v202_v45 = vunpack.c.0.s8 %v201_v44 }
  0x17   :  { %v59_v3 = vsub.s32 1, %v2282_v2  ;;  %v2286_v4 = vsub.s32 0, %v2282_v2  ;;  %v66_v5 = vsub.s32 2, %v2282_v2  ;;  %v73_v10 = vsub.s32 3, %v2282_v2  ;;  %v46_v23 = vld [vmem:[%s3971_s7] sm:$0xff] }
  0x18   :  { %v80_v12 = vsub.s32 4, %v2282_v2  ;;  %v87_v14 = vsub.s32 5, %v2282_v2  ;;  %v94_v16 = vsub.s32 6, %v2282_v2  ;;  %v101_v18 = vsub.s32 7, %v2282_v2  ;;  %v2311_v32 = vld [vmem:[#allocation2] sm:$0xff] }
  0x19   :  { %v60_v8 = vrot.slane %v49_v7, %v59_v3  ;;  %v53_v9 = vrot.slane %v49_v7, %v2286_v4  ;;  %v67_v11 = vrot.slane %v49_v7, %v66_v5  ;;  %v74_v13 = vrot.slane %v49_v7, %v73_v10  ;;  %4028 = vst [vmem:[#allocation8_spill] sm:$0xff] %v2311_v32 }
  0x1a   :  { %v81_v15 = vrot.slane %v49_v7, %v80_v12  ;;  %v88_v17 = vrot.slane %v49_v7, %v87_v14  ;;  %v95_v19 = vrot.slane %v49_v7, %v94_v16  ;;  %v102_v20 = vrot.slane %v49_v7, %v101_v18 }
  0x1b   :  { %62 = vbcast.lane.b32.xlu1 %v60_v8, 256  ;;  %55 = vbcast.lane.b32.xlu0 %v53_v9, 256  ;;  %v110_v24 = vrot.slane %v106_v22, %v2286_v4  ;;  %v117_v25 = vrot.slane %v106_v22, %v59_v3  ;;  %v124_v26 = vrot.slane %v106_v22, %v66_v5 }
  0x1c   :  { %v131_v27 = vrot.slane %v106_v22, %v73_v10  ;;  %v138_v28 = vrot.slane %v106_v22, %v80_v12  ;;  %v145_v29 = vrot.slane %v106_v22, %v87_v14  ;;  %v152_v30 = vrot.slane %v106_v22, %v94_v16 }
  0x1d   :  { %v159_v31 = vrot.slane %v106_v22, %v101_v18  ;;  %v2323_v46 = vsub.s32 %v202_v45, %v2282_v2  ;;  %v4037_v45 = vmov 0 }
  0x1f   :  { %69 = vbcast.lane.b32.xlu1 %v67_v11, 256  ;;  %76 = vbcast.lane.b32.xlu0 %v74_v13, 256 }
  0x23   :  { %83 = vbcast.lane.b32.xlu1 %v81_v15, 256  ;;  %90 = vbcast.lane.b32.xlu0 %v88_v17, 256 }
  0x27   :  { %97 = vbcast.lane.b32.xlu1 %v95_v19, 256  ;;  %104 = vbcast.lane.b32.xlu0 %v102_v20, 256 }
  0x2b   :  { %305 = vperm.xlu1 %2131, %v44_v21   ;;  %2027 = vperm.xlu0 %2130, %v46_v23  }
  0x2f   :  { %112 = vbcast.lane.b32.xlu1 %v110_v24, 256  ;;  %119 = vbcast.lane.b32.xlu0 %v117_v25, 256 }
  0x33   :  { %126 = vbcast.lane.b32.xlu1 %v124_v26, 256  ;;  %133 = vbcast.lane.b32.xlu0 %v131_v27, 256 }
  0x37   :  { %140 = vbcast.lane.b32.xlu1 %v138_v28, 256  ;;  %147 = vbcast.lane.b32.xlu0 %v145_v29, 256 }
  0x3b   :  { %154 = vbcast.lane.b32.xlu1 %v152_v30, 256  ;;  %161 = vbcast.lane.b32.xlu0 %v159_v31, 256  ;;  %v179_v31 = vld [vmem:[%s3966_s2 + $0x1] sm:$0x1] }
  0x3c   :  { %vm182_vm0 = vcmp.ne.f32.partialorder %v179_v31, 0.0 }
  0x8d   :  { %v2325_v48 = vpop.permute.xlu1 %62 }
  0x8e   :  { %4029 = vst [vmem:[#allocation9_spill] sm:$0xff] %v2325_v48 }
  0x91   :  { %v2334_v58 = vpop.permute.xlu1 %69 }
  0x92   :  { %4030 = vst [vmem:[#allocation10_spill] sm:$0xff] %v2334_v58 }
  0x94   :  { %v2313_v33 = vpop.permute.xlu0 %172 }
  0x95   :  { %v2317_v34 = vadd.f32 %v2313_v33, %v2311_v32  ;;  %v2347_v12 = vpop.permute.xlu1 %83 }
  0x96   :  { %4032 = vst [vmem:[#allocation12_spill] sm:$0xff] %v2347_v12 }
  0x97   :  { %v189_v35 = vrot.slane %v2317_v34, 4 }
  0x98   :  { %v2328_v51 = vpop.permute.xlu0 %55 }
  0x99   :  { %v190_v36 = vmax.f32 %v2317_v34, %v189_v35  ;;  %v2357_v24 = vpop.permute.xlu1 %97 }
  0x9a   :  { %4034 = vst [vmem:[#allocation14_spill] sm:$0xff] %v2357_v24 }
  0x9b   :  { %v191_v37 = vrot.slane %v190_v36, 2 }
  0x9c   :  { %v2339_v0 = vpop.permute.xlu0 %76 }
  0x9d   :  { %v192_v38 = vmax.f32 %v190_v36, %v191_v37  ;;  %4031 = vst [vmem:[#allocation11_spill] sm:$0xff] %v2339_v0  ;;  %v313_v36 = vsel %vm182_vm0, 1, %v3980_v1 }
  0x9f   :  { %v193_v39 = vrot.slane %v192_v38, 1 }
  0xa0   :  { %v2351_v17 = vpop.permute.xlu0 %90 }
  0xa1   :  { %v194_v40 = vmax.f32 %v192_v38, %v193_v39  ;;  %4033 = vst [vmem:[#allocation13_spill] sm:$0xff] %v2351_v17 }
  0xa3   :  { %v195_v41 = vsub.f32 %v2317_v34, %v194_v40 }
  0xa4   :  { %v2360_v27 = vpop.permute.xlu0 %104 }
  0xa5   :  { %v196_v42 = vmul.f32 1.442695, %v195_v41  ;;  %4035 = vst [vmem:[#allocation15_spill] sm:$0xff] %v2360_v27  ;;  %v317_v41 = vrot.slane %v313_v36, %v2286_v4 }
  0xa7   :  { %2132 = vpow2.f32 %v196_v42  ;;  %vm2371_vm1 = vcmp.eq.s32.totalorder %v317_v41, 1 }
  0xa8   :  { %v4038_v45 = vsel %vm2371_vm1, 4294967295, %v4037_v45 }
  0xaa   :  { %v2366_v35 = vpop.permute.xlu1 %305 }
  0xab   :  { %4036 = vst [vmem:[#allocation16_spill] sm:$0xff] %v2366_v35  ;;  %v308_v39 = vadd.f32 %v2366_v35, %v194_v40 }
  0xb1   :  { %v2133_v47 = vpop.eup %2132 }
  0xb2   :  { %v199_v49 = vcombine.high %v2133_v47, %v2133_v47  ;;  %v206_v50 = vrot.slane %v2133_v47, %v2323_v46 }
  0xb4   :  { %v214_v52 = vcombine.high %v206_v50, %v206_v50  ;;  %v222_v53 = vrot.slane %v206_v50, %v2323_v46  ;;  %v213_v54 = vrot.slane %v199_v49, %v2323_v46 }
  0xb6   :  { %v236_v55 = vrot.slane %v214_v52, %v2323_v46  ;;  %v251_v56 = vrot.slane %v222_v53, %v2286_v4  ;;  %v244_v57 = vcombine.high %v222_v53, %v222_v53  ;;  %v215_v59 = vcombine.high %v213_v54, %v213_v54 }
  0xb7   :  { %v229_v63 = vrot.slane %v213_v54, %v2323_v46 }
  0xb8   :  { %v255_v60 = vrot.slane %v236_v55, %v2286_v4  ;;  %v259_v61 = vrot.slane %v244_v57, %v2286_v4  ;;  %v246_v62 = vcombine.high %v236_v55, %v236_v55  ;;  %v288_v5 = vmul.f32 %v251_v56, %v2328_v51 }
  0xb9   :  { %v243_v7 = vrot.slane %v215_v59, %v2323_v46  ;;  %v267_v10 = vrot.slane %v229_v63, %v2286_v4  ;;  %v245_v11 = vcombine.high %v229_v63, %v229_v63 }
  0xba   :  { %v289_v3 = vmul.f32 %v255_v60, %v2325_v48  ;;  %v263_v6 = vrot.slane %v246_v62, %v2286_v4  ;;  %v290_v9 = vmul.f32 %v259_v61, %v2334_v58 }
  0xbb   :  { %v271_v15 = vrot.slane %v243_v7, %v2286_v4  ;;  %v247_v16 = vcombine.high %v243_v7, %v243_v7  ;;  %v292_v19 = vmul.f32 %v267_v10, %v2347_v12  ;;  %v275_v20 = vrot.slane %v245_v11, %v2286_v4 }
  0xbc   :  { %v296_v8 = vadd.f32 %v289_v3, %v288_v5  ;;  %v291_v14 = vmul.f32 %v263_v6, %v2339_v0 }
  0xbd   :  { %v293_v22 = vmul.f32 %v271_v15, %v2351_v17  ;;  %v279_v23 = vrot.slane %v247_v16, %v2286_v4  ;;  %v294_v26 = vmul.f32 %v275_v20, %v2357_v24 }
  0xbe   :  { %v297_v13 = vadd.f32 %v296_v8, %v290_v9 }
  0xbf   :  { %v295_v29 = vmul.f32 %v279_v23, %v2360_v27 }
  0xc0   :  { %v298_v18 = vadd.f32 %v297_v13, %v291_v14 }
  0xc2   :  { %v299_v21 = vadd.f32 %v298_v18, %v292_v19 }
  0xc4   :  { %v300_v25 = vadd.f32 %v299_v21, %v293_v22 }
  0xc6   :  { %v301_v28 = vadd.f32 %v300_v25, %v294_v26 }
  0xc8   :  { %v302_v30 = vadd.f32 %v301_v28, %v295_v29 }
  0xca   :  { %2134 = vlog2.f32 %v302_v30 }
  0xd4   :  { %v2135_v37 = vpop.eup %2134 }
  0xd5   :  { %v310_v38 = vmul.f32 0.6931472, %v2135_v37 }
  0xd7   :  { %v311_v42 = vadd.f32 %v310_v38, %v308_v39 }
  0xd9   :  { %v312_v44 = vadd.f32 %v311_v42, %v178_v43  ;;  %v455_v43 = vld [vmem:[%s3966_s2 + $0x2] sm:$0x1] }
  0xda   :  { %vm457_vm2 = vcmp.ne.f32.partialorder %v455_v43, 0.0 }
  0xdb   :  { %v319_v47 = vsel %vm2371_vm1, %v312_v44, %v2317_v34  ;;  %v582_v44 = vsel %vm457_vm2, 1, %v3980_v1 }
  0xdc   :  { %v463_v49 = vrot.slane %v319_v47, 4 }
  0xde   :  { %v464_v50 = vmax.f32 %v319_v47, %v463_v49 }
  0xe0   :  { %v465_v52 = vrot.slane %v464_v50, 2 }
  0xe2   :  { %v466_v53 = vmax.f32 %v464_v50, %v465_v52 }
  0xe4   :  { %v467_v54 = vrot.slane %v466_v53, 1 }
  0xe6   :  { %v468_v55 = vmax.f32 %v466_v53, %v467_v54  ;;  %v586_v53 = vrot.slane %v582_v44, %v2286_v4 }
  0xe8   :  { %v469_v40 = vsub.f32 %v319_v47, %v468_v55  ;;  %v577_v50 = vadd.f32 %v468_v55, %v2366_v35  ;;  %vm2406_vm3 = vcmp.eq.s32.totalorder %v586_v53, 1 }
  0xea   :  { %v470_v56 = vmul.f32 1.442695, %v469_v40  ;;  %v454_v40 = vld [vmem:[#allocation2 + $0x10] sm:$0xff] }
  0xec   :  { %2136 = vpow2.f32 %v470_v56 }
  0xf6   :  { %v2137_v57 = vpop.eup %2136 }
  0xf7   :  { %v473_v59 = vcombine.high %v2137_v57, %v2137_v57  ;;  %v480_v60 = vrot.slane %v2137_v57, %v2323_v46  ;;  %v4039_v57 = vmov 0 }
  0xf8   :  { %v4040_v57 = vsel %vm2406_vm3, 4294967295, %v4039_v57 }
  0xf9   :  { %v487_v61 = vrot.slane %v473_v59, %v2323_v46  ;;  %v488_v62 = vcombine.high %v480_v60, %v480_v60  ;;  %v496_v63 = vrot.slane %v480_v60, %v2323_v46  ;;  %4041 = vst [vmem:[#allocation17_spill] sm:$0xff] %v4040_v57 }
  0xfb   :  { %v510_v34 = vrot.slane %v488_v62, %v2323_v46  ;;  %v518_v3 = vcombine.high %v496_v63, %v496_v63  ;;  %v489_v5 = vcombine.high %v487_v61, %v487_v61  ;;  %v525_v6 = vrot.slane %v496_v63, %v2286_v4 }
  0xfc   :  { %v503_v9 = vrot.slane %v487_v61, %v2323_v46 }
  0xfd   :  { %v520_v7 = vcombine.high %v510_v34, %v510_v34  ;;  %v529_v8 = vrot.slane %v510_v34, %v2286_v4  ;;  %v533_v10 = vrot.slane %v518_v3, %v2286_v4  ;;  %v517_v11 = vrot.slane %v489_v5, %v2323_v46 }
  0xfe   :  { %v562_v14 = vmul.f32 %v525_v6, %v2328_v51  ;;  %v519_v16 = vcombine.high %v503_v9, %v503_v9  ;;  %v541_v18 = vrot.slane %v503_v9, %v2286_v4 }
  0xff   :  { %v537_v13 = vrot.slane %v520_v7, %v2286_v4  ;;  %v563_v15 = vmul.f32 %v529_v8, %v2325_v48  ;;  %v564_v19 = vmul.f32 %v533_v10, %v2334_v58  ;;  %v521_v21 = vcombine.high %v517_v11, %v517_v11 }
 0x100   :  { %v545_v22 = vrot.slane %v517_v11, %v2286_v4  ;;  %v549_v26 = vrot.slane %v519_v16, %v2286_v4  ;;  %v566_v28 = vmul.f32 %v541_v18, %v2347_v12 }
 0x101   :  { %v570_v20 = vadd.f32 %v563_v15, %v562_v14  ;;  %v565_v23 = vmul.f32 %v537_v13, %v2339_v0  ;;  %v553_v30 = vrot.slane %v521_v21, %v2286_v4 }
 0x102   :  { %v567_v31 = vmul.f32 %v545_v22, %v2351_v17  ;;  %v568_v37 = vmul.f32 %v549_v26, %v2357_v24 }
 0x103   :  { %v571_v25 = vadd.f32 %v570_v20, %v564_v19  ;;  %v569_v39 = vmul.f32 %v553_v30, %v2360_v27 }
 0x105   :  { %v572_v29 = vadd.f32 %v571_v25, %v565_v23 }
 0x107   :  { %v573_v36 = vadd.f32 %v572_v29, %v566_v28 }
 0x109   :  { %v574_v38 = vadd.f32 %v573_v36, %v567_v31 }
 0x10b   :  { %v575_v41 = vadd.f32 %v574_v38, %v568_v37 }
 0x10d   :  { %v576_v42 = vadd.f32 %v575_v41, %v569_v39 }
 0x10f   :  { %2138 = vlog2.f32 %v576_v42 }
 0x119   :  { %v2139_v49 = vpop.eup %2138 }
 0x11a   :  { %v579_v52 = vmul.f32 0.6931472, %v2139_v49 }
 0x11c   :  { %v580_v54 = vadd.f32 %v579_v52, %v577_v50 }
 0x11e   :  { %v581_v56 = vadd.f32 %v580_v54, %v454_v40 }
 0x120   :  { %v588_v59 = vsel %vm2406_vm3, %v581_v56, %v319_v47  ;;  %v717_v56 = vld [vmem:[%s3966_s2 + $0x3] sm:$0x1] }
 0x121   :  { %v725_v60 = vrot.slane %v588_v59, 4  ;;  %vm719_vm4 = vcmp.ne.f32.partialorder %v717_v56, 0.0 }
 0x123   :  { %v726_v61 = vmax.f32 %v588_v59, %v725_v60  ;;  %v844_v60 = vsel %vm719_vm4, 1, %v3980_v1 }
 0x125   :  { %v727_v62 = vrot.slane %v726_v61, 2 }
 0x127   :  { %v728_v63 = vmax.f32 %v726_v61, %v727_v62 }
 0x129   :  { %v729_v34 = vrot.slane %v728_v63, 1 }
 0x12b   :  { %v730_v3 = vmax.f32 %v728_v63, %v729_v34  ;;  %v848_v34 = vrot.slane %v844_v60, %v2286_v4 }
 0x12d   :  { %v731_v55 = vsub.f32 %v588_v59, %v730_v3  ;;  %v839_v62 = vadd.f32 %v730_v3, %v2366_v35  ;;  %vm2440_vm5 = vcmp.eq.s32.totalorder %v848_v34, 1 }
 0x12f   :  { %v732_v5 = vmul.f32 1.442695, %v731_v55 }
 0x131   :  { %2140 = vpow2.f32 %v732_v5  ;;  %v716_v5 = vld [vmem:[#allocation2 + $0x18] sm:$0xff] }
 0x13b   :  { %v2141_v6 = vpop.eup %2140 }
 0x13c   :  { %v735_v7 = vcombine.high %v2141_v6, %v2141_v6  ;;  %v742_v8 = vrot.slane %v2141_v6, %v2323_v46 }
 0x13e   :  { %v749_v9 = vrot.slane %v735_v7, %v2323_v46  ;;  %v750_v10 = vcombine.high %v742_v8, %v742_v8  ;;  %v758_v11 = vrot.slane %v742_v8, %v2323_v46  ;;  %v4042_v7 = vmov 0 }
 0x13f   :  { %v4043_v7 = vsel %vm2440_vm5, 4294967295, %v4042_v7 }
 0x140   :  { %v772_v47 = vrot.slane %v750_v10, %v2323_v46  ;;  %v780_v13 = vcombine.high %v758_v11, %v758_v11  ;;  %v751_v14 = vcombine.high %v749_v9, %v749_v9  ;;  %v787_v15 = vrot.slane %v758_v11, %v2286_v4  ;;  %4044 = vst [vmem:[#allocation18_spill] sm:$0xff] %v4043_v7 }
 0x141   :  { %v765_v19 = vrot.slane %v749_v9, %v2323_v46 }
 0x142   :  { %v782_v16 = vcombine.high %v772_v47, %v772_v47  ;;  %v791_v18 = vrot.slane %v772_v47, %v2286_v4  ;;  %v795_v20 = vrot.slane %v780_v13, %v2286_v4  ;;  %v779_v21 = vrot.slane %v751_v14, %v2323_v46 }
 0x143   :  { %v824_v23 = vmul.f32 %v787_v15, %v2328_v51  ;;  %v781_v26 = vcombine.high %v765_v19, %v765_v19  ;;  %v803_v28 = vrot.slane %v765_v19, %v2286_v4 }
 0x144   :  { %v799_v22 = vrot.slane %v782_v16, %v2286_v4  ;;  %v825_v25 = vmul.f32 %v791_v18, %v2325_v48  ;;  %v826_v29 = vmul.f32 %v795_v20, %v2334_v58  ;;  %v783_v31 = vcombine.high %v779_v21, %v779_v21 }
 0x145   :  { %v807_v36 = vrot.slane %v779_v21, %v2286_v4  ;;  %v811_v39 = vrot.slane %v781_v26, %v2286_v4  ;;  %v828_v41 = vmul.f32 %v803_v28, %v2347_v12 }
 0x146   :  { %v832_v30 = vadd.f32 %v825_v25, %v824_v23  ;;  %v827_v37 = vmul.f32 %v799_v22, %v2339_v0  ;;  %v815_v43 = vrot.slane %v783_v31, %v2286_v4 }
 0x147   :  { %v829_v44 = vmul.f32 %v807_v36, %v2351_v17  ;;  %v830_v50 = vmul.f32 %v811_v39, %v2357_v24 }
 0x148   :  { %v833_v38 = vadd.f32 %v832_v30, %v826_v29  ;;  %v831_v53 = vmul.f32 %v815_v43, %v2360_v27 }
 0x14a   :  { %v834_v42 = vadd.f32 %v833_v38, %v827_v37 }
 0x14c   :  { %v835_v49 = vadd.f32 %v834_v42, %v828_v41 }
 0x14e   :  { %v836_v52 = vadd.f32 %v835_v49, %v829_v44 }
 0x150   :  { %v837_v54 = vadd.f32 %v836_v52, %v830_v50 }
 0x152   :  { %v838_v40 = vadd.f32 %v837_v54, %v831_v53 }
 0x154   :  { %2142 = vlog2.f32 %v838_v40 }
 0x15e   :  { %v2143_v61 = vpop.eup %2142 }
 0x15f   :  { %v841_v63 = vmul.f32 0.6931472, %v2143_v61 }
 0x161   :  { %v842_v55 = vadd.f32 %v841_v63, %v839_v62 }
 0x163   :  { %v843_v6 = vadd.f32 %v842_v55, %v716_v5 }
 0x165   :  { %v850_v8 = vsel %vm2440_vm5, %v843_v6, %v588_v59 }
 0x166   :  { %v987_v9 = vrot.slane %v850_v8, 4 }
 0x168   :  { %v988_v10 = vmax.f32 %v850_v8, %v987_v9  ;;  %v979_v9 = vld [vmem:[%s3966_s2 + $0x4] sm:$0x1] }
 0x169   :  { %vm981_vm6 = vcmp.ne.f32.partialorder %v979_v9, 0.0 }
 0x16a   :  { %v989_v11 = vrot.slane %v988_v10, 2 }
 0x16c   :  { %v990_v47 = vmax.f32 %v988_v10, %v989_v11  ;;  %v1106_v10 = vsel %vm981_vm6, 1, %v3980_v1 }
 0x16e   :  { %v991_v13 = vrot.slane %v990_v47, 1 }
 0x170   :  { %v992_v14 = vmax.f32 %v990_v47, %v991_v13 }
 0x172   :  { %v993_v3 = vsub.f32 %v850_v8, %v992_v14  ;;  %v1101_v47 = vadd.f32 %v992_v14, %v2366_v35 }
 0x174   :  { %v994_v15 = vmul.f32 1.442695, %v993_v3  ;;  %v1110_v3 = vrot.slane %v1106_v10, %v2286_v4 }
 0x176   :  { %2144 = vpow2.f32 %v994_v15  ;;  %vm2474_vm7 = vcmp.eq.s32.totalorder %v1110_v3, 1 }
 0x180   :  { %v2145_v16 = vpop.eup %2144 }
 0x181   :  { %v997_v18 = vcombine.high %v2145_v16, %v2145_v16  ;;  %v1004_v19 = vrot.slane %v2145_v16, %v2323_v46  ;;  %v978_v16 = vld [vmem:[#allocation2 + $0x20] sm:$0xff] }
 0x183   :  { %v1011_v20 = vrot.slane %v997_v18, %v2323_v46  ;;  %v1012_v21 = vcombine.high %v1004_v19, %v1004_v19  ;;  %v1020_v22 = vrot.slane %v1004_v19, %v2323_v46  ;;  %v4045_v19 = vmov 0 }
 0x184   :  { %v4046_v19 = vsel %vm2474_vm7, 4294967295, %v4045_v19 }
 0x185   :  { %v1034_v59 = vrot.slane %v1012_v21, %v2323_v46  ;;  %v1042_v23 = vcombine.high %v1020_v22, %v1020_v22  ;;  %v1013_v25 = vcombine.high %v1011_v20, %v1011_v20  ;;  %v1049_v26 = vrot.slane %v1020_v22, %v2286_v4  ;;  %4047 = vst [vmem:[#allocation19_spill] sm:$0xff] %v4046_v19 }
 0x186   :  { %v1027_v30 = vrot.slane %v1011_v20, %v2323_v46 }
 0x187   :  { %v1044_v28 = vcombine.high %v1034_v59, %v1034_v59  ;;  %v1053_v29 = vrot.slane %v1034_v59, %v2286_v4  ;;  %v1057_v31 = vrot.slane %v1042_v23, %v2286_v4  ;;  %v1041_v36 = vrot.slane %v1013_v25, %v2323_v46 }
 0x188   :  { %v1086_v38 = vmul.f32 %v1049_v26, %v2328_v51  ;;  %v1043_v41 = vcombine.high %v1027_v30, %v1027_v30  ;;  %v1065_v42 = vrot.slane %v1027_v30, %v2286_v4 }
 0x189   :  { %v1061_v37 = vrot.slane %v1044_v28, %v2286_v4  ;;  %v1087_v39 = vmul.f32 %v1053_v29, %v2325_v48  ;;  %v1088_v43 = vmul.f32 %v1057_v31, %v2334_v58  ;;  %v1045_v49 = vcombine.high %v1041_v36, %v1041_v36 }
 0x18a   :  { %v1069_v50 = vrot.slane %v1041_v36, %v2286_v4  ;;  %v1073_v54 = vrot.slane %v1043_v41, %v2286_v4  ;;  %v1090_v40 = vmul.f32 %v1065_v42, %v2347_v12 }
 0x18b   :  { %v1094_v44 = vadd.f32 %v1087_v39, %v1086_v38  ;;  %v1089_v52 = vmul.f32 %v1061_v37, %v2339_v0  ;;  %v1077_v60 = vrot.slane %v1045_v49, %v2286_v4 }
 0x18c   :  { %v1091_v61 = vmul.f32 %v1069_v50, %v2351_v17  ;;  %v1092_v63 = vmul.f32 %v1073_v54, %v2357_v24 }
 0x18d   :  { %v1095_v53 = vadd.f32 %v1094_v44, %v1088_v43  ;;  %v1093_v55 = vmul.f32 %v1077_v60, %v2360_v27 }
 0x18f   :  { %v1096_v56 = vadd.f32 %v1095_v53, %v1089_v52 }
 0x191   :  { %v1097_v62 = vadd.f32 %v1096_v56, %v1090_v40 }
 0x193   :  { %v1098_v34 = vadd.f32 %v1097_v62, %v1091_v61 }
 0x195   :  { %v1099_v5 = vadd.f32 %v1098_v34, %v1092_v63 }
 0x197   :  { %v1100_v6 = vadd.f32 %v1099_v5, %v1093_v55 }
 0x199   :  { %2146 = vlog2.f32 %v1100_v6 }
 0x1a3   :  { %v2147_v11 = vpop.eup %2146 }
 0x1a4   :  { %v1103_v13 = vmul.f32 0.6931472, %v2147_v11 }
 0x1a6   :  { %v1104_v15 = vadd.f32 %v1103_v13, %v1101_v47 }
 0x1a8   :  { %v1105_v18 = vadd.f32 %v1104_v15, %v978_v16 }
 0x1aa   :  { %v2480_v20 = vsel %vm2474_vm7, %v1105_v18, %v850_v8 }
 0x1ab   :  { %v1249_v21 = vrot.slane %v2480_v20, 4 }
 0x1ad   :  { %v1250_v22 = vmax.f32 %v2480_v20, %v1249_v21  ;;  %v2049_v21 = vld [vmem:[%s3966_s2] sm:$0xff] }
 0x1af   :  { %v1251_v59 = vrot.slane %v1250_v22, 2 }
 0x1b1   :  { %v1252_v14 = vmax.f32 %v1250_v22, %v1251_v59  ;;  %v2050_v59 = vrot.slane %v2049_v21, 4 }
 0x1b3   :  { %v1253_v23 = vrot.slane %v1252_v14, 1 }
 0x1b5   :  { %v1254_v25 = vmax.f32 %v1252_v14, %v1253_v23  ;;  %v1241_v14 = vld [vmem:[%s3966_s2 + $0x5] sm:$0x1]  ;;  %v2051_v23 = vadd.f32 %v2050_v59, %v2049_v21 }
 0x1b6   :  { %vm1243_vm8 = vcmp.ne.f32.partialorder %v1241_v14, 0.0  ;;  %v2059_v21 = vld [vmem:[%s3965_s1] sm:$0xff] }
 0x1b7   :  { %v1255_v26 = vsub.f32 %v2480_v20, %v1254_v25 }
 0x1b9   :  { %v1256_v28 = vmul.f32 1.442695, %v1255_v26  ;;  %v2052_v26 = vrot.slane %v2051_v23, 2 }
 0x1bb   :  { %2148 = vpow2.f32 %v1256_v28  ;;  %v1368_v28 = vsel %vm1243_vm8, 1, %v3980_v1 }
 0x1c5   :  { %v2149_v29 = vpop.eup %2148 }
 0x1c6   :  { %v1259_v30 = vcombine.high %v2149_v29, %v2149_v29  ;;  %v1266_v31 = vrot.slane %v2149_v29, %v2323_v46 }
 0x1c8   :  { %v1273_v36 = vrot.slane %v1259_v30, %v2323_v46  ;;  %v1274_v8 = vcombine.high %v1266_v31, %v1266_v31  ;;  %v1282_v37 = vrot.slane %v1266_v31, %v2323_v46  ;;  %v1363_v30 = vadd.f32 %v1254_v25, %v2366_v35 }
 0x1ca   :  { %v1296_v38 = vrot.slane %v1274_v8, %v2323_v46  ;;  %v1304_v39 = vcombine.high %v1282_v37, %v1282_v37  ;;  %v1275_v41 = vcombine.high %v1273_v36, %v1273_v36  ;;  %v1311_v42 = vrot.slane %v1282_v37, %v2286_v4 }
 0x1cb   :  { %v1289_v49 = vrot.slane %v1273_v36, %v2323_v46  ;;  %v1372_v36 = vrot.slane %v1368_v28, %v2286_v4  ;;  %v2053_v8 = vadd.f32 %v2052_v26, %v2051_v23 }
 0x1cc   :  { %v1306_v43 = vcombine.high %v1296_v38, %v1296_v38  ;;  %v1315_v44 = vrot.slane %v1296_v38, %v2286_v4  ;;  %v1319_v50 = vrot.slane %v1304_v39, %v2286_v4  ;;  %v1303_v52 = vrot.slane %v1275_v41, %v2323_v46  ;;  %v1240_v38 = vld [vmem:[#allocation2 + $0x28] sm:$0xff] }
 0x1cd   :  { %v1348_v54 = vmul.f32 %v1311_v42, %v2328_v51  ;;  %v1305_v56 = vcombine.high %v1289_v49, %v1289_v49  ;;  %v1327_v60 = vrot.slane %v1289_v49, %v2286_v4  ;;  %vm2516_vm9 = vcmp.eq.s32.totalorder %v1372_v36, 1  ;;  %v2534_v49 = vld [vmem:[%s3966_s2] sm:$0x1]  ;;  %v2601_v36 = vld [vmem:[%s3965_s1 + $0x3] ss:$0 sm:$0xff] }
 0x1ce   :  { %v1323_v53 = vrot.slane %v1306_v43, %v2286_v4  ;;  %v1349_v40 = vmul.f32 %v1315_v44, %v2325_v48  ;;  %v1350_v61 = vmul.f32 %v1319_v50, %v2334_v58  ;;  %v1307_v63 = vcombine.high %v1303_v52, %v1303_v52  ;;  %v2523_v43 = vld [vmem:[%s3965_s1] ss:$0 sm:$0xff]  ;;  %4051 = vst [vmem:[#allocation21_spill] sm:$0xff] %v2534_v49 }
 0x1cf   :  { %v1331_v34 = vrot.slane %v1303_v52, %v2286_v4  ;;  %v1335_v6 = vrot.slane %v1305_v56, %v2286_v4  ;;  %v1352_v9 = vmul.f32 %v1327_v60, %v2347_v12  ;;  %v4048_v41 = vmov 0  ;;  %4056 = vst [vmem:[#allocation24_spill] sm:$0xff] %v2601_v36 }
 0x1d0   :  { %v1356_v62 = vadd.f32 %v1349_v40, %v1348_v54  ;;  %v1351_v55 = vmul.f32 %v1323_v53, %v2339_v0  ;;  %v1339_v11 = vrot.slane %v1307_v63, %v2286_v4  ;;  %v4049_v41 = vsel %vm2516_vm9, 4294967295, %v4048_v41  ;;  %v2542_v53 = vld [vmem:[%s3965_s1 + $0x1] ss:$0 sm:$0xff] }
 0x1d1   :  { %v1353_v47 = vmul.f32 %v1331_v34, %v2351_v17  ;;  %v1354_v3 = vmul.f32 %v1335_v6, %v2357_v24  ;;  %4050 = vst [vmem:[#allocation20_spill] sm:$0xff] %v4049_v41  ;;  %v2054_v42 = vrot.slane %v2053_v8, 1  ;;  %vm4006_vm10 = vcmp.eq.s32.totalorder %v2282_v2, %v2523_v43 }
 0x1d2   :  { %v1357_v5 = vadd.f32 %v1356_v62, %v1350_v61  ;;  %v1355_v16 = vmul.f32 %v1339_v11, %v2360_v27  ;;  %vm3973_vm11 = vcmp.ne.f32.partialorder %v2534_v49, 0.0  ;;  %vm3999_vm12 = vcmp.eq.s32.totalorder %v2282_v2, %v2542_v53 }
 0x1d3   :  { %v2055_v50 = vadd.f32 %v2054_v42, %v2053_v8  ;;  %v444_v62 = vsel %vm3973_vm11, 1, %v3980_v1  ;;  %v2559_v34 = vsel %vm3999_vm12, 1, %v3980_v1 }
 0x1d4   :  { %v1358_v10 = vadd.f32 %v1357_v5, %v1351_v55  ;;  %v448_v6 = vrot.slane %v444_v62, %v2286_v4  ;;  %v2648_v62 = vld [vmem:[%s3965_s1 + $0x4] ss:$0 sm:$0xff] }
 0x1d5   :  { %v2120_v60 = vtrunc.f32 %v2055_v50  ;;  %4057 = vst [vmem:[#allocation25_spill] sm:$0xff] %v2648_v62 }
 0x1d6   :  { %v1359_v13 = vadd.f32 %v1358_v10, %v1352_v9  ;;  %vm449_vm13 = vcmp.eq.s32.totalorder %v448_v6, 1  ;;  %v2659_v6 = vld [vmem:[%s3965_s1 + $0x5] ss:$0 sm:$0xff] }
 0x1d7   :  { %v2121_v9 = vcvt.f32.s32 %v2120_v60  ;;  %vm2590_vm15 = vmand %vm449_vm13, %vm4006_vm10  ;;  %4058 = vst [vmem:[#allocation26_spill] sm:$0xff] %v2659_v6 }
 0x1d8   :  { %v1360_v15 = vadd.f32 %v1359_v13, %v1353_v47  ;;  %v597_v47 = vrot.slane %v2559_v34, %v2323_v46 }
 0x1da   :  { %v1361_v18 = vadd.f32 %v1360_v15, %v1354_v3  ;;  %v2573_v15 = vld [vmem:[%s3965_s1 + $0x2] ss:$0 sm:$0xff]  ;;  %v605_v14 = vcombine.high %v597_v47, %v597_v47 }
 0x1db   :  { %4052 = vst [vmem:[#allocation22_spill] sm:$0xff] %v2573_v15  ;;  %vm3974_vm14 = vcmp.eq.s32.totalorder %v2282_v2, %v2573_v15  ;;  %v4061_v15 = vmov 0  }
 0x1dc   :  { %v1362_v22 = vadd.f32 %v1361_v18, %v1355_v16  ;;  %v2119_v18 = vadd.s32 4294967295, %v2121_v9  ;;  %v2607_v8 = vsel %vm3974_vm14, 1, %v3980_v1  ;;  %vm3995_vm14 = vcmp.eq.s32.totalorder %v2282_v2, %v2601_v36 }
 0x1dd   :  { %v2665_v9 = vsel %vm3995_vm14, 1, %v3980_v1 }
 0x1de   :  { %2150 = vlog2.f32 %v1362_v22  ;;  %vm2058_vm4 = vcmp.eq.s32.totalorder %v2282_v2, %v2119_v18 }
 0x1e8   :  { %v2151_v29 = vpop.eup %2150 }
 0x1e9   :  { %v1365_v31 = vmul.f32 0.6931472, %v2151_v29  ;;  %v4053_v29 = vmov 0 }
 0x1ea   :  { %v4054_v29 = vsel %vm2590_vm15, 4294967295, %v4053_v29 }
 0x1eb   :  { %v1366_v37 = vadd.f32 %v1365_v31, %v1363_v30  ;;  %4055 = vst [vmem:[#allocation23_spill] sm:$0xff] %v4054_v29  ;;  %v2060_v30 = vcvt.s32.f32 %v2059_v21  ;;  %v2596_v31 = vrot.slane %v597_v47, %v2323_v46 }
 0x1ed   :  { %v1367_v39 = vadd.f32 %v1366_v37, %v1240_v38  ;;  %v2610_v37 = vrot.slane %v605_v14, %v2323_v46  ;;  %v2061_v42 = vsel %vm2058_vm4, %v2060_v30, 0.0  ;;  %vm3993_vm4 = vcmp.eq.s32.totalorder %v2282_v2, %v2659_v6 }
 0x1ee   :  { %v1121_v30 = vrot.slane %v2665_v9, %v2323_v46 }
 0x1ef   :  { %v2528_v25 = vsel %vm2516_vm9, %v1367_v39, %v2480_v20  ;;  %v320_v20 = vsel %vm4006_vm10, 1, %v3980_v1 }
 0x1f0   :  { %v1511_v44 = vrot.slane %v2528_v25, 4  ;;  %v321_v40 = vcombine.high %v320_v20, %v320_v20  ;;  %v328_v56 = vrot.slane %v320_v20, %v2323_v46  ;;  %v1129_v7 = vcombine.high %v1121_v30, %v1121_v30 }
 0x1f2   :  { %v1512_v52 = vmax.f32 %v2528_v25, %v1511_v44  ;;  %v335_v55 = vrot.slane %v321_v40, %v2323_v46  ;;  %v336_v5 = vcombine.high %v328_v56, %v328_v56  ;;  %v344_v11 = vrot.slane %v328_v56, %v2323_v46 }
 0x1f3   :  { %v1637_v40 = vsel %vm3993_vm4, 1, %v3980_v1 }
 0x1f4   :  { %v1513_v54 = vrot.slane %v1512_v52, 2  ;;  %v337_v3 = vcombine.high %v335_v55, %v335_v55  ;;  %v358_v16 = vrot.slane %v336_v5, %v2323_v46  ;;  %v366_v59 = vcombine.high %v344_v11, %v344_v11 }
 0x1f5   :  { %v2582_v26 = vrot.slane %v335_v55, %v2323_v46  ;;  %vm370_vm0 = vcmp.ne.s32.totalorder %v344_v11, 0  ;;  %v1638_v19 = vcombine.high %v1637_v40, %v1637_v40 }
 0x1f6   :  { %v1514_v61 = vmax.f32 %v1512_v52, %v1513_v54  ;;  %v368_v23 = vcombine.high %v358_v16, %v358_v16  ;;  %v2585_v28 = vrot.slane %v337_v3, %v2323_v46  ;;  %vm371_vm2 = vcmp.ne.s32.totalorder %v358_v16, 0 }
 0x1f7   :  { %vm372_vm6 = vcmp.ne.s32.totalorder %v366_v59, 0  ;;  %vm374_vm13 = vcmp.ne.s32.totalorder %v2582_v26, 0  ;;  %v2618_v39 = vsel %vm370_vm0, 1, %v3980_v1  ;;  %v2621_v44 = vsel %vm371_vm2, 1, %v3980_v1 }
 0x1f8   :  { %v1515_v63 = vrot.slane %v1514_v61, 1  ;;  %vm373_vm8 = vcmp.ne.s32.totalorder %v368_v23, 0  ;;  %vm375_vm11 = vcmp.ne.s32.totalorder %v2585_v28, 0  ;;  %v2624_v50 = vsel %vm372_vm6, 1, %v3980_v1 }
 0x1f9   :  { %v859_v52 = vrot.slane %v2607_v8, %v2323_v46  ;;  %v2633_v54 = vsel %vm373_vm8, 1, %v3980_v1  ;;  %vm639_vm0 = vcmp.ne.s32.totalorder %v2596_v31, 0  ;;  %vm640_vm2 = vcmp.ne.s32.totalorder %v2610_v37, 0 }
 0x1fa   :  { %v2563_v10 = vmax.f32 %v1514_v61, %v1515_v63  ;;  %v2640_v56 = vsel %vm374_vm13, 1, %v3980_v1  ;;  %v2643_v60 = vsel %vm375_vm11, 1, %v3980_v1  ;;  %v2062_v61 = vrot.slane %v2061_v42, 4 }
 0x1fb   :  { %v2675_v3 = vsel %vm639_vm0, 1, %v3980_v1  ;;  %v2678_v16 = vsel %vm640_vm2, 1, %v3980_v1  ;;  %v867_v18 = vcombine.high %v859_v52, %v859_v52  ;;  %v2682_v59 = vrot.slane %v859_v52, %v2323_v46 }
 0x1fc   :  { %v1517_v13 = vsub.f32 %v2528_v25, %v2563_v10  ;;  %vm3994_vm11 = vcmp.eq.s32.totalorder %v2282_v2, %v2648_v62  ;;  %v2690_v23 = vadd.f32 %v2062_v61, %v2061_v42  ;;  %v635_v63 = vcombine.high %v2596_v31, %v2596_v31 }
 0x1fd   :  { %v2704_v42 = vsel %vm3994_vm11, 1, %v3980_v1  ;;  %v2709_v14 = vrot.slane %v867_v18, %v2323_v46  ;;  %vm901_vm8 = vcmp.ne.s32.totalorder %v2682_v59, 0 }
 0x1fe   :  { %v1518_v22 = vmul.f32 1.442695, %v1517_v13  ;;  %v2672_v13 = vld [vmem:[%s3965_s1 + $0x6] ss:$0 sm:$0xff]  ;;  %4060 = vst [vmem:[#allocation28_spill] sm:$0xff] %v2690_v23  ;;  %v1383_v55 = vrot.slane %v2704_v42, %v2323_v46  ;;  %v2733_v41 = vsel %vm901_vm8, 1, %v3980_v1 }
 0x1ff   :  { %4059 = vst [vmem:[#allocation27_spill] sm:$0xff] %v2672_v13  ;;  %vm3992_vm6 = vcmp.eq.s32.totalorder %v2282_v2, %v2672_v13  ;;  %vm902_vm8 = vcmp.ne.s32.totalorder %v2709_v14, 0 }
 0x200   :  { %2152 = vpow2.f32 %v1518_v22  ;;  %v1899_v61 = vsel %vm3992_vm6, 1, %v3980_v1  ;;  %v2741_v6 = vrot.slane %v1383_v55, %v2323_v46 }
 0x202   :  { %vm1425_vm0 = vcmp.ne.s32.totalorder %v2741_v6, 0 }
 0x20a   :  { %v2153_v11 = vpop.eup %2152 }
 0x20b   :  { %v1521_v21 = vcombine.high %v2153_v11, %v2153_v11  ;;  %v1528_v22 = vrot.slane %v2153_v11, %v2323_v46 }
 0x20d   :  { %v1535_v52 = vrot.slane %v1521_v21, %v2323_v46  ;;  %v1536_v11 = vcombine.high %v1528_v22, %v1528_v22  ;;  %v1544_v38 = vrot.slane %v1528_v22, %v2323_v46  ;;  %v2714_v22 = vrot.slane %v1121_v30, %v2323_v46 }
 0x20f   :  { %v1558_v21 = vrot.slane %v1536_v11, %v2323_v46  ;;  %v1566_v47 = vcombine.high %v1544_v38, %v1544_v38  ;;  %v1537_v18 = vcombine.high %v1535_v52, %v1535_v52  ;;  %v1573_v20 = vrot.slane %v1544_v38, %v2286_v4 }
 0x210   :  { %v1551_v49 = vrot.slane %v1535_v52, %v2323_v46  ;;  %v1645_v38 = vrot.slane %v1637_v40, %v2323_v46  ;;  %vm1163_vm13 = vcmp.ne.s32.totalorder %v2714_v22, 0 }
 0x211   :  { %v1568_v11 = vcombine.high %v1558_v21, %v1558_v21  ;;  %v1577_v5 = vrot.slane %v1558_v21, %v2286_v4  ;;  %v1581_v23 = vrot.slane %v1566_v47, %v2286_v4  ;;  %v1907_v21 = vrot.slane %v1899_v61, %v2323_v46 }
 0x212   :  { %v1565_v31 = vrot.slane %v1537_v18, %v2323_v46  ;;  %v1610_v47 = vmul.f32 %v1573_v20, %v2328_v51  ;;  %v2748_v13 = vrot.slane %v1645_v38, %v2323_v46  ;;  %v1567_v36 = vcombine.high %v1551_v49, %v1551_v49 }
 0x213   :  { %v1585_v52 = vrot.slane %v1568_v11, %v2286_v4  ;;  %v1611_v1 = vmul.f32 %v1577_v5, %v2325_v48  ;;  %v1589_v32 = vrot.slane %v1551_v49, %v2286_v4  ;;  %v1612_v29 = vmul.f32 %v1581_v23, %v2334_v58 }
 0x214   :  { %v1653_v57 = vcombine.high %v1645_v38, %v1645_v38  ;;  %v1915_v11 = vcombine.high %v1907_v21, %v1907_v21  ;;  %v2757_v20 = vsel %vm1163_vm13, 1, %v4061_v15  ;;  %v1569_v40 = vcombine.high %v1565_v31, %v1565_v31 }
 0x215   :  { %v1618_v18 = vadd.f32 %v1611_v1, %v1610_v47  ;;  %v1593_v5 = vrot.slane %v1565_v31, %v2286_v4  ;;  %v1613_v30 = vmul.f32 %v1585_v52, %v2339_v0  ;;  %v2763_v49 = vrot.slane %v1638_v19, %v2323_v46 }
 0x216   :  { %v1923_v1 = vrot.slane %v1907_v21, %v2323_v46  ;;  %vm1687_vm2 = vcmp.ne.s32.totalorder %v2748_v13, 0  ;;  %v1900_v23 = vcombine.high %v1899_v61, %v1899_v61  ;;  %v1597_v38 = vrot.slane %v1567_v36, %v2286_v4 }
 0x217   :  { %v1619_v62 = vadd.f32 %v1618_v18, %v1612_v29  ;;  %v1614_v47 = vmul.f32 %v1589_v32, %v2347_v12  ;;  %v2771_v31 = vrot.slane %v1915_v11, %v2323_v46  ;;  %v2776_v19 = vsel %vm1425_vm0, 1, %v4061_v15 }
 0x218   :  { %v2779_v21 = vrot.slane %v1129_v7, %v2323_v46  ;;  %v1601_v52 = vrot.slane %v1569_v40, %v2286_v4  ;;  %v1615_v61 = vmul.f32 %v1593_v5, %v2351_v17  ;;  %v1391_v18 = vcombine.high %v1383_v55, %v1383_v55  ;;  %v1503_v40 = vld [vmem:[%s3966_s2 + $0x6] sm:$0x1] }
 0x219   :  { %v1620_v58 = vadd.f32 %v1619_v62, %v1613_v30  ;;  %v1945_v62 = vcombine.high %v1923_v1, %v1923_v1  ;;  %v2788_v11 = vsel %vm1687_vm2, 1, %v4061_v15  ;;  %v2793_v7 = vsel %vm902_vm8, 1, %v4061_v15 }
 0x21a   :  { %v1616_v55 = vmul.f32 %v1597_v38, %v2357_v24  ;;  %v2801_v30 = vrot.slane %v1653_v57, %v2323_v46  ;;  %vm1949_vm13 = vcmp.ne.s32.totalorder %v1923_v1, 0  ;;  %vm1164_vm0 = vcmp.ne.s32.totalorder %v2779_v21, 0 }
 0x21b   :  { %v1621_v36 = vadd.f32 %v1620_v58, %v1614_v47  ;;  %v1914_v58 = vrot.slane %v1900_v23, %v2323_v46  ;;  %vm1950_vm2 = vcmp.ne.s32.totalorder %v2771_v31, 0  ;;  %v1617_v29 = vmul.f32 %v1601_v52, %v2360_v27  ;;  %v3058_v27 = vpop.permute.xlu1 %112 }
 0x21c   :  { %v1413_v17 = vrot.slane %v1391_v18, %v2323_v46  ;;  %vm641_vm8 = vcmp.ne.s32.totalorder %v635_v63, 0  ;;  %vm1505_vm6 = vcmp.ne.f32.partialorder %v1503_v40, 0.0  ;;  %vm2820_vm4 = vcmp.ne.s32.totalorder %v1945_v62, 0 }
 0x21d   :  { %v1622_v5 = vadd.f32 %v1621_v36, %v1615_v61  ;;  %v2818_v61 = vld [vmem:[%s3966_s2 + $0x7] sm:$0x1]  ;;  %v1916_v52 = vcombine.high %v1914_v58, %v1914_v58  ;;  %vm1688_vm11 = vcmp.ne.s32.totalorder %v2801_v30, 0  ;;  %v897_v18 = vcombine.high %v2682_v59, %v2682_v59 }
 0x21e   :  { %4062 = vst [vmem:[#allocation29_spill] sm:$0xff] %v2818_v61  ;;  %v2829_v40 = vsel %vm1949_vm13, 1, %v4061_v15  ;;  %v2839_v62 = vsel %vm1950_vm2, 1, %v4061_v15  ;;  %vm1426_vm14 = vcmp.ne.s32.totalorder %v1413_v17, 0  ;;  %v1159_v59 = vcombine.high %v2714_v22, %v2714_v22 }
 0x21f   :  { %v1623_v32 = vadd.f32 %v1622_v5, %v1616_v55  ;;  %4065 = vst [vmem:[#allocation30_spill] sm:$0xff] %v2829_v40  ;;  %v2834_v55 = vsel %vm1164_vm0, 1, %v4061_v15  ;;  %4066 = vst [vmem:[#allocation31_spill] sm:$0xff] %v2839_v62  ;;  %vm3998_vm13 = vcmp.ne.f32.partialorder %v2818_v61, 0.0  ;;  %v2849_v1 = vrot.slane %v1914_v58, %v2323_v46 }
 0x220   :  { %v2852_v5 = vsel %vm1688_vm11, 1, %v4061_v15  ;;  %v1421_v57 = vcombine.high %v2741_v6, %v2741_v6  ;;  %v2857_v47 = vrot.slane %v1916_v52, %v2323_v46  ;;  %v2865_v58 = vsel %vm1426_vm14, 1, %v4061_v15 }
 0x221   :  { %v1624_v63 = vadd.f32 %v1623_v32, %v1617_v29  ;;  %v2842_v29 = vsel %vm641_vm8, 1, %v4061_v15  ;;  %v1630_v32 = vsel %vm1505_vm6, 1, %v4061_v15  ;;  %4067 = vst [vmem:[#allocation32_spill] sm:$0xff] %v2849_v1  ;;  %vm903_vm6 = vcmp.ne.s32.totalorder %v897_v18, 0 }
 0x222   :  { %4068 = vst [vmem:[#allocation33_spill] sm:$0xff] %v2857_v47  ;;  %v1634_v38 = vrot.slane %v1630_v32, %v2286_v4  ;;  %v2874_v52 = vsel %vm3998_vm13, 1, %v4061_v15  ;;  %vm2878_vm11 = vcmp.ne.s32.totalorder %v1159_v59, 0  ;;  %v1683_v32 = vcombine.high %v2748_v13, %v2748_v13 }
 0x223   :  { %2154 = vlog2.f32 %v1624_v63  ;;  %4069 = vst [vmem:[#allocation34_spill] sm:$0xff] %v2874_v52  ;;  %v2885_v23 = vsel %vm903_vm6, 1, %v4061_v15  ;;  %vm1427_vm14 = vcmp.ne.s32.totalorder %v1421_v57, 0  ;;  %v899_v22 = vcombine.high %v2709_v14, %v2709_v14 }
 0x224   :  { %v1161_v6 = vcombine.high %v2779_v21, %v2779_v21  ;;  %v1423_v61 = vcombine.high %v1413_v17, %v1413_v17  ;;  %v1685_v59 = vcombine.high %v2801_v30, %v2801_v30  ;;  %v590_v63 = vcombine.high %v2559_v34, %v2559_v34 }
 0x225   :  { %v852_v13 = vcombine.high %v2607_v8, %v2607_v8  ;;  %v1114_v14 = vcombine.high %v2665_v9, %v2665_v9  ;;  %v1376_v17 = vcombine.high %v2704_v42, %v2704_v42  ;;  %vm2905_vm0 = vcmp.eq.s32.totalorder %v1634_v38, 1 }
 0x226   :  { %v4072_v21 = vmov 0  ;;  %v2914_v8 = vsel %vm2878_vm11, 1, %v4061_v15  ;;  %v2917_v30 = vsel %vm1427_vm14, 1, %v4061_v15  ;;  %vm2919_vm2 = vcmp.ne.s32.totalorder %v1683_v32, 0 }
 0x227   :  { %v4073_v21 = vsel %vm2905_vm0, 4294967295, %v4072_v21  ;;  %v2926_v42 = vsel %vm2820_vm4, 1, %v4061_v15  ;;  %v4078_v38 = vcombine.high %v2610_v37, %v2610_v37  ;;  %vm2935_vm6 = vcmp.ne.s32.totalorder %v899_v22, 0 }
 0x228   :  { %4074 = vst [vmem:[#allocation35_spill] sm:$0xff] %v4073_v21  ;;  %4077 = vst [vmem:[#allocation36_spill] sm:$0xff] %v2926_v42  ;;  %vm2939_vm11 = vcmp.ne.s32.totalorder %v1161_v6, 0  ;;  %vm2943_vm14 = vcmp.ne.s32.totalorder %v1423_v61, 0  ;;  %vm2947_vm4 = vcmp.ne.s32.totalorder %v1685_v59, 0  ;;  %v604_v37 = vrot.slane %v590_v63, %v2323_v46 }
 0x229   :  { %vm2931_vm8 = vcmp.ne.s32.totalorder %v4078_v38, 0  ;;  %v2953_v22 = vrot.slane %v852_v13, %v2323_v46  ;;  %v4089_v6 = vrot.slane %v2618_v39, %v2286_v4  ;;  %v4092_v61 = vrot.slane %v2621_v44, %v2286_v4 }
 0x22a   :  { %v1625_v63 = vadd.f32 %v2563_v10, %v2366_v35  ;;  %v2972_v13 = vrot.slane %v1114_v14, %v2323_v46  ;;  %v2975_v39 = vrot.slane %v1376_v17, %v2323_v46  ;;  %v2993_v17 = vsel %vm2931_vm8, 1, %v4061_v15 }
 0x22b   :  { %vm2958_vm13 = vcmp.eq.s32.totalorder %v4089_v6, 1  ;;  %vm2965_vm12 = vcmp.eq.s32.totalorder %v4092_v61, 1  ;;  %v2984_v61 = vsel %vm2919_vm2, 1, %v4061_v15  ;;  %v2998_v44 = vsel %vm2935_vm6, 1, %v4061_v15  ;;  %v3005_v6 = vld [vmem:[#allocation2 + $0x30] sm:$0xff] }
 0x22c   :  { %4095 = vst [vmem:[#allocation37_spill] sm:$0xff] %v2984_v61  ;;  %v3003_v9 = vsel %vm2939_vm11, 1, %v4061_v15  ;;  %4097 = vst [vmem:[#allocation39_spill] sm:$0xff] %v3005_v6  ;;  %v3015_v47 = vsel %vm2947_vm4, 1, %v4061_v15  ;;  %v4099_v18 = vcombine.high %v2771_v31, %v2771_v31  ;;  %v3025_v32 = vrot.slane %v604_v37, %v2323_v46 }
 0x22d   :  { %v2155_v57 = vpop.eup %2154  ;;  %4098 = vst [vmem:[#allocation40_spill] sm:$0xff] %v3015_v47  ;;  %v4102_v36 = vrot.slane %v2624_v50, %v2286_v4  ;;  %v3041_v31 = vrot.slane %v2972_v13, %v2323_v46  ;;  %v4110_v42 = vrot.slane %v2633_v54, %v2286_v4  ;;  %v1130_v54 = vcombine.high %v2972_v13, %v2972_v13 }
 0x22e   :  { %v1627_v52 = vmul.f32 0.6931472, %v2155_v57  ;;  %v2988_v57 = vpop.permute.xlu0 %2027  ;;  %vm3020_vm2 = vcmp.ne.s32.totalorder %v4099_v18, 0  ;;  %v3045_v18 = vrot.slane %v2975_v39, %v2323_v46  ;;  %vm643_vm11 = vcmp.ne.s32.totalorder %v3025_v32, 0 }
 0x22f   :  { %4096 = vst [vmem:[#allocation38_spill] sm:$0xff] %v2988_v57  ;;  %vm3030_vm8 = vcmp.eq.s32.totalorder %v4102_v36, 1  ;;  %v3037_v57 = vrot.slane %v2953_v22, %v2323_v46  ;;  %v3066_v36 = vrot.slane %v2763_v49, %v2323_v46  ;;  %v3081_v50 = vsel %vm3020_vm2, 1, %v4061_v15 }
 0x230   :  { %v1628_v14 = vadd.f32 %v1627_v52, %v1625_v63  ;;  %v3010_v52 = vsel %vm2943_vm14, 1, %v4061_v15  ;;  %4109 = vst [vmem:[#allocation42_spill] sm:$0xff] %v3081_v50  ;;  %vm3087_vm14 = vcmp.eq.s32.totalorder %v4110_v42, 1  ;;  %v868_v63 = vcombine.high %v2953_v22, %v2953_v22 }
 0x231   :  { %v1392_v42 = vcombine.high %v2975_v39, %v2975_v39  ;;  %v4113_v24 = vrot.slane %v2675_v3, %v2286_v4  ;;  %v4116_v22 = vrot.slane %v2678_v16, %v2286_v4  ;;  %v426_v39 = vsel %vm2958_vm13, %v3058_v27, 0.0 }
 0x232   :  { %v1629_v34 = vadd.f32 %v1628_v14, %v3005_v6  ;;  %v606_v6 = vcombine.high %v604_v37, %v604_v37  ;;  %v4106_v37 = vcombine.high %v2582_v26, %v2582_v26  ;;  %vm4122_vm13 = vcmp.ne.s32.totalorder %v3037_v57, 0 }
 0x233   :  { %vm3109_vm2 = vcmp.eq.s32.totalorder %v4113_v24, 1  ;;  %v409_v24 = vrot.slane %v2643_v60, %v2286_v4  ;;  %v3142_v60 = vpop.permute.xlu1 %126  ;;  %v3147_v38 = vsel %vm4122_vm13, 1, %v4061_v15  ;;  %v3164_v62 = vrot.slane %v1130_v54, %v2323_v46 }
 0x234   :  { %v3056_v35 = vsel %vm2905_vm0, %v1629_v34, %v2528_v25  ;;  %vm3071_vm6 = vcmp.ne.s32.totalorder %v4106_v37, 0  ;;  %v3091_v37 = vpop.permute.xlu0 %119  ;;  %v3100_v21 = vrot.slane %v606_v6, %v2323_v46  ;;  %vm3116_vm0 = vcmp.eq.s32.totalorder %v4116_v22, 1 }
 0x235   :  { %4105 = vst [vmem:[#allocation41_spill] sm:$0xff] %v3056_v35  ;;  %v1773_v25 = vrot.slane %v3056_v35, 4  ;;  %v427_v16 = vsel %vm2965_vm12, %v3091_v37, 0.0  ;;  %v651_v6 = vsel %vm643_vm11, 1, %v4061_v15  ;;  %v4119_v22 = vrot.slane %v2640_v56, %v2286_v4 }
 0x236   :  { %vm4123_vm12 = vcmp.ne.s32.totalorder %v3041_v31, 0  ;;  %vm4124_vm11 = vcmp.ne.s32.totalorder %v3045_v18, 0  ;;  %vm644_vm10 = vcmp.ne.s32.totalorder %v3100_v21, 0  ;;  %v3167_v12 = vrot.slane %v1392_v42, %v2323_v46 }
 0x237   :  { %v1774_v34 = vmax.f32 %v3056_v35, %v1773_v25  ;;  %vm3138_vm4 = vcmp.eq.s32.totalorder %v4119_v22, 1  ;;  %v3152_v59 = vsel %vm4123_vm12, 1, %v4061_v15  ;;  %v3157_v56 = vsel %vm4124_vm11, 1, %v4061_v15 }
 0x238   :  { %4125 = vst [vmem:[#allocation43_spill] sm:$0xff] %v3157_v56  ;;  %v3160_v22 = vrot.slane %v868_v63, %v2323_v46  ;;  %v434_v40 = vadd.f32 %v427_v16, %v426_v39  ;;  %v4126_v0 = vrot.slane %v2842_v29, %v2286_v4  ;;  %v674_v63 = vrot.slane %v651_v6, %v2286_v4  ;;  %v3194_v39 = vpop.permute.xlu0 %133 }
 0x239   :  { %v1775_v3 = vrot.slane %v1774_v34, 2  ;;  %vm4129_vm12 = vcmp.ne.s32.totalorder %v3066_v36, 0  ;;  %vm4130_vm11 = vcmp.ne.s32.totalorder %v2849_v1, 0  ;;  %v652_v10 = vsel %vm644_vm10, 1, %v4061_v15 }
 0x23a   :  { %vm3172_vm13 = vcmp.eq.s32.totalorder %v4126_v0, 1  ;;  %v3185_v54 = vsel %vm4130_vm11, 1, %v4061_v15  ;;  %v428_v0 = vsel %vm3030_vm8, %v3142_v60, 0.0  ;;  %v4135_v16 = vrot.slane %v2733_v41, %v2286_v4 }
 0x23b   :  { %v1776_v50 = vmax.f32 %v1774_v34, %v1775_v3  ;;  %v3180_v34 = vsel %vm4129_vm12, 1, %v4061_v15  ;;  %v636_v3 = vcombine.high %v3025_v32, %v3025_v32  ;;  %vm3200_vm12 = vcmp.eq.s32.totalorder %v409_v24, 1 }
 0x23c   :  { %v4133_v32 = vcombine.high %v2763_v49, %v2763_v49  ;;  %vm3218_vm8 = vcmp.eq.s32.totalorder %v4135_v16, 1  ;;  %v4138_v6 = vrot.slane %v2793_v7, %v2286_v4  ;;  %vm906_vm10 = vcmp.ne.s32.totalorder %v3160_v22, 0 }
 0x23d   :  { %v1777_v42 = vrot.slane %v1776_v50, 1  ;;  %vm1168_vm9 = vcmp.ne.s32.totalorder %v3164_v62, 0  ;;  %vm1430_vm7 = vcmp.ne.s32.totalorder %v3167_v12, 0  ;;  %v435_v49 = vadd.f32 %v434_v40, %v428_v0 }
 0x23e   :  { %v3211_v29 = vrot.slane %v4133_v32, %v2323_v46  ;;  %vm3225_vm11 = vcmp.eq.s32.totalorder %v4138_v6, 1  ;;  %v4141_v41 = vrot.slane %v2993_v17, %v2286_v4  ;;  %v384_v16 = vsel %vm3071_vm6, 1, %v4061_v15  ;;  %v3252_v6 = vpop.permute.xlu1 %140 }
 0x23f   :  { %v3213_v48 = vmax.f32 %v1776_v50, %v1777_v42  ;;  %v429_v17 = vsel %vm3087_vm14, %v3194_v39, 0.0  ;;  %v678_v0 = vrot.slane %v652_v10, %v2286_v4  ;;  %vm645_vm15 = vcmp.ne.s32.totalorder %v636_v3, 0 }
 0x240   :  { %vm3235_vm5 = vcmp.eq.s32.totalorder %v4141_v41, 1  ;;  %v3255_v32 = vsel %vm906_vm10, 1, %v4061_v15  ;;  %v3258_v41 = vsel %vm1168_vm9, 1, %v4061_v15  ;;  %v3261_v14 = vsel %vm1430_vm7, 1, %v4061_v15 }
 0x241   :  { %4134 = vst [vmem:[#allocation44_spill] sm:$0xff] %v3213_v48  ;;  %v1779_v40 = vsub.f32 %v3056_v35, %v3213_v48  ;;  %vm1692_vm6 = vcmp.ne.s32.totalorder %v3211_v29, 0  ;;  %v695_v26 = vsel %vm3109_vm2, %v3058_v27, 0.0  ;;  %v696_v3 = vsel %vm3116_vm0, %v3091_v37, 0.0 }
 0x242   :  { %v4144_v10 = vrot.slane %v2885_v23, %v2286_v4  ;;  %v4147_v35 = vcombine.high %v2585_v28, %v2585_v28  ;;  %vm3280_vm9 = vcmp.eq.s32.totalorder %v674_v63, 1  ;;  %v413_v47 = vrot.slane %v384_v16, %v2286_v4  ;;  %v3311_v16 = vpop.permute.xlu0 %147 }
 0x243   :  { %v1780_v42 = vmul.f32 1.442695, %v1779_v40  ;;  %v436_v40 = vadd.f32 %v435_v49, %v429_v17  ;;  %v653_v25 = vsel %vm645_vm15, 1, %v4061_v15  ;;  %v898_v23 = vcombine.high %v3037_v57, %v3037_v57 }
 0x244   :  { %vm3273_vm14 = vcmp.eq.s32.totalorder %v4144_v10, 1  ;;  %vm377_vm7 = vcmp.ne.s32.totalorder %v4147_v35, 0  ;;  %v430_v10 = vsel %vm3138_vm4, %v3252_v6, 0.0  ;;  %v1160_v35 = vcombine.high %v3041_v31, %v3041_v31 }
 0x245   :  { %2156 = vpow2.f32 %v1780_v42  ;;  %v638_v28 = vcombine.high %v3100_v21, %v3100_v21  ;;  %v4150_v63 = vrot.slane %v2757_v20, %v2286_v4  ;;  %v4153_v57 = vrot.slane %v2834_v55, %v2286_v4 }
 0x246   :  { %v703_v13 = vadd.f32 %v696_v3, %v695_v26  ;;  %v940_v31 = vrot.slane %v3255_v32, %v2286_v4  ;;  %v385_v21 = vsel %vm377_vm7, 1, %v4061_v15  ;;  %v900_v20 = vcombine.high %v3160_v22, %v3160_v22 }
 0x247   :  { %vm3298_vm0 = vcmp.eq.s32.totalorder %v4150_v63, 1  ;;  %vm3305_vm15 = vcmp.eq.s32.totalorder %v4153_v57, 1  ;;  %v697_v17 = vsel %vm3172_vm13, %v3142_v60, 0.0  ;;  %v3326_v32 = vsel %vm1692_vm6, 1, %v4061_v15 }
 0x248   :  { %v4156_v3 = vrot.slane %v2998_v44, %v2286_v4  ;;  %v437_v61 = vadd.f32 %v436_v40, %v430_v10  ;;  %vm3335_vm2 = vcmp.eq.s32.totalorder %v678_v0, 1  ;;  %vm3339_vm13 = vcmp.eq.s32.totalorder %v413_v47, 1 }
 0x249   :  { %v682_v26 = vrot.slane %v653_v25, %v2286_v4  ;;  %vm907_vm10 = vcmp.ne.s32.totalorder %v898_v23, 0  ;;  %v431_v44 = vsel %vm3200_vm12, %v3311_v16, 0.0  ;;  %vm3347_vm6 = vcmp.ne.s32.totalorder %v1160_v35, 0 }
 0x24a   :  { %vm3331_vm4 = vcmp.eq.s32.totalorder %v4156_v3, 1  ;;  %v417_v0 = vrot.slane %v385_v21, %v2286_v4  ;;  %vm3352_vm7 = vcmp.ne.s32.totalorder %v638_v28, 0  ;;  %v4167_v47 = vrot.slane %v2776_v19, %v2286_v4  ;;  %v3376_v28 = vpop.permute.xlu1 %154 }
 0x24b   :  { %v957_v1 = vsel %vm3218_vm8, %v3058_v27, 0.0  ;;  %v958_v23 = vsel %vm3225_vm11, %v3091_v37, 0.0  ;;  %v4170_v10 = vrot.slane %v2914_v8, %v2286_v4  ;;  %v704_v19 = vadd.f32 %v703_v13, %v697_v17 }
 0x24c   :  { %vm3359_vm3 = vcmp.eq.s32.totalorder %v4167_v47, 1  ;;  %vm908_vm1 = vcmp.ne.s32.totalorder %v900_v20, 0  ;;  %v698_v24 = vsel %vm3235_vm5, %v3194_v39, 0.0  ;;  %v915_v21 = vsel %vm907_vm10, 1, %v4061_v15 }
 0x24d   :  { %vm3372_vm12 = vcmp.eq.s32.totalorder %v4170_v10, 1  ;;  %v4173_v47 = vrot.slane %v3147_v38, %v2286_v4  ;;  %v438_v20 = vadd.f32 %v437_v61, %v431_v44  ;;  %vm3393_vm11 = vcmp.eq.s32.totalorder %v682_v26, 1 }
 0x24e   :  { %v3400_v50 = vsel %vm3347_vm6, 1, %v4061_v15  ;;  %v654_v10 = vsel %vm3352_vm7, 1, %v4061_v15  ;;  %v4178_v38 = vrot.slane %v2865_v58, %v2286_v4  ;;  %v965_v26 = vadd.f32 %v958_v23, %v957_v1 }
 0x24f   :  { %vm3389_vm8 = vcmp.eq.s32.totalorder %v4173_v47, 1  ;;  %v4181_v61 = vrot.slane %v3003_v9, %v2286_v4  ;;  %v432_v3 = vsel %vm3339_vm13, %v3376_v28, 0.0  ;;  %v3423_v40 = vsel %vm908_vm1, 1, %v4061_v15  ;;  %v2157_v57 = vpop.eup %2156 }
 0x250   :  { %vm3408_vm5 = vcmp.eq.s32.totalorder %v4178_v38, 1  ;;  %v1162_v58 = vcombine.high %v3164_v62, %v3164_v62  ;;  %v959_v1 = vsel %vm3273_vm14, %v3142_v60, 0.0  ;;  %v705_v23 = vadd.f32 %v704_v19, %v698_v24 }
 0x251   :  { %vm3415_vm10 = vcmp.eq.s32.totalorder %v4181_v61, 1  ;;  %v944_v9 = vrot.slane %v915_v21, %v2286_v4  ;;  %vm3431_vm6 = vcmp.eq.s32.totalorder %v417_v0, 1  ;;  %v3435_v61 = vpop.permute.xlu0 %161  ;;  %v699_v8 = vsel %vm3280_vm9, %v3252_v6, 0.0  ;;  %v4231_v0 = vld [vmem:[#allocation30_spill] sm:$0xff] }
 0x252   :  { %vm3440_vm1 = vcmp.eq.s32.totalorder %v940_v31, 1  ;;  %v686_v19 = vrot.slane %v654_v10, %v2286_v4  ;;  %v1783_v24 = vcombine.high %v2157_v57, %v2157_v57  ;;  %v1790_v21 = vrot.slane %v2157_v57, %v2323_v46 }
 0x253   :  { %v439_v56 = vadd.f32 %v438_v20, %v432_v3  ;;  %v1219_v31 = vsel %vm3298_vm0, %v3058_v27, 0.0  ;;  %v1220_v7 = vsel %vm3305_vm15, %v3091_v37, 0.0  ;;  %v4188_v10 = vrot.slane %v2917_v30, %v2286_v4 }
 0x254   :  { %v966_v57 = vadd.f32 %v965_v26, %v959_v1  ;;  %vm3465_vm9 = vcmp.ne.s32.totalorder %v1162_v58, 0  ;;  %v433_v49 = vsel %vm3431_vm6, %v3435_v61, 0.0  ;;  %v1797_v3 = vrot.slane %v1783_v24, %v2323_v46 }
 0x255   :  { %vm3461_vm14 = vcmp.eq.s32.totalorder %v4188_v10, 1  ;;  %v1798_v42 = vcombine.high %v1790_v21, %v1790_v21  ;;  %v1806_v48 = vrot.slane %v1790_v21, %v2323_v46  ;;  %v706_v55 = vadd.f32 %v705_v23, %v699_v8  ;;  %v4226_v23 = vld [vmem:[#allocation43_spill] sm:$0xff] }
 0x256   :  { %vm4193_vm0 = vcmp.eq.s32.totalorder %v2282_v2, %v2523_v43  ;;  %v960_v26 = vsel %vm3331_vm4, %v3194_v39, 0.0  ;;  %v4194_v58 = vrot.slane %v3152_v59, %v2286_v4  ;;  %v700_v8 = vsel %vm3335_vm2, %v3311_v16, 0.0 }
 0x257   :  { %v176_v30 = vsel %vm4193_vm0, %v2313_v33, 0.0  ;;  %vm3491_vm13 = vcmp.eq.s32.totalorder %v686_v19, 1  ;;  %v1820_v33 = vrot.slane %v1798_v42, %v2323_v46  ;;  %v1828_v43 = vcombine.high %v1806_v48, %v1806_v48 }
 0x258   :  { %vm3484_vm15 = vcmp.eq.s32.totalorder %v4194_v58, 1  ;;  %v1227_v22 = vadd.f32 %v1220_v7, %v1219_v31  ;;  %vm3496_vm4 = vcmp.eq.s32.totalorder %v944_v9, 1  ;;  %v440_v59 = vadd.f32 %v439_v56, %v433_v49 }
 0x259   :  { %v1799_v24 = vcombine.high %v1797_v3, %v1797_v3  ;;  %v1835_v21 = vrot.slane %v1806_v48, %v2286_v4  ;;  %v4201_v63 = vrot.slane %v2788_v11, %v2286_v4  ;;  %v4202_v19 = vmov 0 }
 0x25a   :  { %v1481_v10 = vsel %vm3359_vm3, %v3058_v27, 0.0  ;;  %v4204_v9 = vrot.slane %v2852_v5, %v2286_v4  ;;  %v1221_v56 = vsel %vm3372_vm12, %v3142_v60, 0.0  ;;  %vm4207_vm6 = vcmp.eq.s32.totalorder %v2282_v2, %v2542_v53 }
 0x25b   :  { %vm3504_vm2 = vcmp.eq.s32.totalorder %v4201_v63, 1  ;;  %vm4208_vm0 = vnez %v4038_v45  ;;  %v1830_v25 = vcombine.high %v1820_v33, %v1820_v33  ;;  %v1839_v5 = vrot.slane %v1820_v33, %v2286_v4  ;;  %v4217_v33 = vld [vmem:[#allocation9_spill] sm:$0xff] }
 0x25c   :  { %v4203_v19 = vsel %vm3504_vm2, 4294967295, %v4202_v19  ;;  %vm3514_vm7 = vcmp.eq.s32.totalorder %v4204_v9, 1  ;;  %vm3526_vm2 = vmand %vm4208_vm0, %vm4207_vm6  ;;  %v967_v48 = vadd.f32 %v966_v57, %v960_v26  ;;  %v707_v31 = vadd.f32 %v706_v55, %v700_v8 }
 0x25d   :  { %v1813_v49 = vrot.slane %v1797_v3, %v2323_v46  ;;  %v1843_v42 = vrot.slane %v1828_v43, %v2286_v4  ;;  %v4211_v35 = vrot.slane %v3010_v52, %v2286_v4  ;;  %v961_v45 = vsel %vm3389_vm8, %v3252_v6, 0.0 }
 0x25e   :  { %v701_v57 = vsel %vm3393_vm11, %v3376_v28, 0.0  ;;  %v1482_v55 = vsel %vm3408_vm5, %v3091_v37, 0.0  ;;  %v1228_v3 = vadd.f32 %v1227_v22, %v1221_v56  ;;  %v1222_v52 = vsel %vm3415_vm10, %v3194_v39, 0.0 }
 0x25f   :  { %vm3536_vm3 = vcmp.eq.s32.totalorder %v4211_v35, 1  ;;  %v4214_v26 = vrot.slane %v3258_v41, %v2286_v4  ;;  %v442_v13 = vsel %vm3526_vm2, %v440_v59, 0.0  ;;  %v1827_v17 = vrot.slane %v1799_v24, %v2323_v46 }
 0x260   :  { %v1847_v47 = vrot.slane %v1830_v25, %v2286_v4  ;;  %v1872_v8 = vmul.f32 %v1835_v21, %v2328_v51  ;;  %v1873_v43 = vmul.f32 %v1839_v5, %v4217_v33  ;;  %v4218_v44 = vcombine.high %v3045_v18, %v3045_v18  ;;  %v4221_v21 = vld [vmem:[#allocation10_spill] sm:$0xff]  ;;  %v4222_v25 = vld [vmem:[#allocation37_spill] sm:$0xff] }
 0x261   :  { %vm3555_vm12 = vcmp.eq.s32.totalorder %v4214_v26, 1  ;;  %v968_v22 = vadd.f32 %v967_v48, %v961_v45  ;;  %v962_v59 = vsel %vm3440_vm1, %v3311_v16, 0.0  ;;  %v708_v63 = vadd.f32 %v707_v31, %v701_v57  ;;  %v4230_v57 = vld [vmem:[#allocation11_spill] sm:$0xff] }
 0x262   :  { %vm3568_vm8 = vcmp.ne.s32.totalorder %v4218_v44, 0  ;;  %v702_v46 = vsel %vm3491_vm13, %v3435_v61, 0.0  ;;  %v1829_v51 = vcombine.high %v1813_v49, %v1813_v49  ;;  %v1851_v24 = vrot.slane %v1813_v49, %v2286_v4 }
 0x263   :  { %v1874_v9 = vmul.f32 %v1843_v42, %v4221_v21  ;;  %v1880_v18 = vadd.f32 %v1873_v43, %v1872_v8  ;;  %v1489_v56 = vadd.f32 %v1482_v55, %v1481_v10  ;;  %v4223_v5 = vrot.slane %v4222_v25, %v2286_v4  ;;  %v4238_v25 = vld [vmem:[#allocation17_spill] sm:$0xff] }
 0x264   :  { %v1483_v62 = vsel %vm3461_vm14, %v3142_v60, 0.0  ;;  %v4227_v31 = vrot.slane %v4226_v23, %v2286_v4  ;;  %v1178_v10 = vsel %vm3465_vm9, 1, %v4061_v15  ;;  %v443_v42 = vadd.f32 %v442_v13, %v176_v30 }
 0x265   :  { %vm3583_vm11 = vcmp.eq.s32.totalorder %v4223_v5, 1  ;;  %v1831_v35 = vcombine.high %v1827_v17, %v1827_v17  ;;  %v1855_v45 = vrot.slane %v1827_v17, %v2286_v4  ;;  %v1875_v55 = vmul.f32 %v1847_v47, %v4230_v57  ;;  %v4235_v17 = vld [vmem:[#allocation12_spill] sm:$0xff] }
 0x266   :  { %vm3593_vm5 = vcmp.eq.s32.totalorder %v4227_v31, 1  ;;  %v1881_v26 = vadd.f32 %v1880_v18, %v1874_v9  ;;  %v4232_v8 = vrot.slane %v4231_v0, %v2286_v4  ;;  %v1229_v43 = vadd.f32 %v1228_v3, %v1222_v52  ;;  %v4236_v18 = vld [vmem:[#allocation22_spill] sm:$0xff]  ;;  %v4243_v52 = vld [vmem:[#allocation31_spill] sm:$0xff] }
 0x267   :  { %v1223_v20 = vsel %vm3484_vm15, %v3252_v6, 0.0  ;;  %v969_v44 = vadd.f32 %v968_v22, %v962_v59  ;;  %v709_v30 = vadd.f32 %v708_v63, %v702_v46  ;;  %v1859_v13 = vrot.slane %v1829_v51, %v2286_v4  ;;  %v4247_v46 = vld [vmem:[#allocation40_spill] sm:$0xff] }
 0x268   :  { %vm3605_vm10 = vcmp.eq.s32.totalorder %v4232_v8, 1  ;;  %v1876_v21 = vmul.f32 %v1851_v24, %v4235_v17  ;;  %v1882_v47 = vadd.f32 %v1881_v26, %v1875_v55  ;;  %v963_v9 = vsel %vm3496_vm4, %v3376_v28, 0.0  ;;  %v4258_v55 = vld [vmem:[#allocation23_spill] sm:$0xff]  ;;  %v4260_v26 = vld [vmem:[#allocation8_spill] sm:$0xff] }
 0x269   :  { %vm4237_vm1 = vcmp.eq.s32.totalorder %v2282_v2, %v4236_v18  ;;  %vm4239_vm14 = vnez %v4238_v25  ;;  %vm4242_vm15 = vnez %v4203_v19  ;;  %v4244_v22 = vrot.slane %v4243_v52, %v2286_v4  ;;  %v4262_v25 = vld [vmem:[#allocation14_spill] sm:$0xff] }
 0x26a   :  { %vm3622_vm9 = vmand %vm4239_vm14, %vm4237_vm1  ;;  %v1743_v1 = vsel %vm4242_vm15, %v3058_v27, 0.0  ;;  %v1744_v38 = vsel %vm3514_vm7, %v3091_v37, 0.0  ;;  %v1490_v63 = vadd.f32 %v1489_v56, %v1483_v62  ;;  %v4248_v51 = vrot.slane %v4247_v46, %v2286_v4  ;;  %v4257_v62 = vld [vmem:[#allocation13_spill] sm:$0xff] }
 0x26b   :  { %vm3632_vm13 = vcmp.eq.s32.totalorder %v4244_v22, 1  ;;  %v4251_v19 = vrot.slane %v3261_v14, %v2286_v4  ;;  %v4254_v23 = vrot.slane %v3423_v40, %v2286_v4  ;;  %v1863_v56 = vrot.slane %v1831_v35, %v2286_v4  ;;  %v4273_v22 = vld [vmem:[#allocation15_spill] sm:$0xff] }
 0x26c   :  { %vm3642_vm4 = vcmp.eq.s32.totalorder %v4248_v51, 1  ;;  %v1877_v31 = vmul.f32 %v1855_v45, %v4257_v62  ;;  %v1883_v57 = vadd.f32 %v1882_v47, %v1876_v21  ;;  %vm4259_vm7 = vnez %v4258_v55  ;;  %v4263_v21 = vld [vmem:[#allocation36_spill] sm:$0xff] }
 0x26d   :  { %vm3649_vm6 = vcmp.eq.s32.totalorder %v4251_v19, 1  ;;  %vm3656_vm0 = vcmp.eq.s32.totalorder %v4254_v23, 1  ;;  %v4261_v14 = vsel %vm4259_vm7, %v4260_v26, 0.0  ;;  %v1484_v8 = vsel %vm3536_vm3, %v3194_v39, 0.0  ;;  %v2164_v47 = vld [vmem:[#allocation2 + $0x8] sm:$0xff] }
 0x26e   :  { %v452_v0 = vadd.f32 %v4261_v14, %v443_v42  ;;  %v1230_v17 = vadd.f32 %v1229_v43, %v1223_v20  ;;  %v970_v40 = vadd.f32 %v969_v44, %v963_v9  ;;  %v711_v18 = vsel %vm3622_vm9, %v709_v30, 0.0  ;;  %v4274_v19 = vld [vmem:[#allocation33_spill] sm:$0xff]  ;;  %v4278_v55 = vld [vmem:[#allocation24_spill] sm:$0xff]  ;;  %v4303_v43 = vld [vmem:[#allocation19_spill] sm:$0xff] }
 0x26f   :  { %v1878_v52 = vmul.f32 %v1859_v13, %v4262_v25  ;;  %v1884_v35 = vadd.f32 %v1883_v57, %v1877_v31  ;;  %v1224_v45 = vsel %vm3555_vm12, %v3311_v16, 0.0  ;;  %v964_v42 = vsel %vm3656_vm0, %v3435_v61, 0.0  ;;  %v4301_v23 = vld [vmem:[#allocation25_spill] sm:$0xff] }
 0x270   :  { %v4264_v53 = vrot.slane %v4263_v21, %v2286_v4  ;;  %v4267_v20 = vrot.slane %v3180_v34, %v2286_v4  ;;  %v4270_v58 = vrot.slane %v3400_v50, %v2286_v4  ;;  %v1439_v13 = vsel %vm3568_vm8, 1, %v4061_v15 }
 0x271   :  { %v713_v9 = vsel %vm3526_vm2, %v2164_v47, 0.0  ;;  %v1210_v34 = vrot.slane %v1178_v10, %v2286_v4  ;;  %v1879_v46 = vmul.f32 %v1863_v56, %v4273_v22  ;;  %v1885_v51 = vadd.f32 %v1884_v35, %v1878_v52 }
 0x272   :  { %vm3681_vm3 = vcmp.eq.s32.totalorder %v4264_v53, 1  ;;  %vm3688_vm1 = vcmp.eq.s32.totalorder %v4267_v20, 1  ;;  %vm3695_vm12 = vcmp.eq.s32.totalorder %v4270_v58, 1  ;;  %vm1954_vm14 = vcmp.ne.s32.totalorder %v4274_v19, 0  ;;  %v2165_v20 = vld [vmem:[#allocation2 + $0x10] sm:$0xff] }
 0x273   :  { %v4275_v50 = vcombine.high %v3167_v12, %v3167_v12  ;;  %v712_v41 = vadd.f32 %v711_v18, %v452_v0  ;;  %v1751_v7 = vadd.f32 %v1744_v38, %v1743_v1  ;;  %v1491_v62 = vadd.f32 %v1490_v63, %v1484_v8  ;;  %v4280_v1 = vld [vmem:[#allocation18_spill] sm:$0xff]  ;;  %v4314_v0 = vld [vmem:[#allocation44_spill] sm:$0xff] }
 0x274   :  { %v1231_v31 = vadd.f32 %v1230_v17, %v1224_v45  ;;  %v971_v11 = vadd.f32 %v970_v40, %v964_v42  ;;  %v1886_v57 = vadd.f32 %v1885_v51, %v1879_v46  ;;  %v1745_v10 = vsel %vm3583_vm11, %v3142_v60, 0.0  ;;  %v4284_v63 = vld [vmem:[#allocation42_spill] sm:$0xff] }
 0x275   :  { %vm3710_vm15 = vcmp.ne.s32.totalorder %v4275_v50, 0  ;;  %v1485_v56 = vsel %vm3593_vm5, %v3252_v6, 0.0  ;;  %v1225_v12 = vsel %vm3695_vm12, %v3376_v28, 0.0  ;;  %vm4279_vm2 = vcmp.eq.s32.totalorder %v2282_v2, %v4278_v55  ;;  %v1764_v38 = vld [vmem:[#allocation2 + $0x38] sm:$0xff] }
 0x276   :  { %vm4281_vm8 = vnez %v4280_v1  ;;  %v4285_v48 = vrot.slane %v4284_v63, %v2286_v4  ;;  %v1468_v49 = vrot.slane %v1439_v13, %v2286_v4  ;;  %v4288_v14 = vcombine.high %v3066_v36, %v3066_v36 }
 0x277   :  { %vm3728_vm0 = vmand %vm4281_vm8, %vm4279_vm2  ;;  %vm3747_vm7 = vcmp.eq.s32.totalorder %v1210_v34, 1  ;;  %v1686_v17 = vcombine.high %v3211_v29, %v3211_v29  ;;  %2158 = vlog2.f32 %v1886_v57  ;;  %v2005_v40 = vsel %vm3605_vm10, %v3058_v27, 0.0 }
 0x278   :  { %vm3735_vm11 = vcmp.eq.s32.totalorder %v4285_v48, 1  ;;  %vm3743_vm5 = vcmp.ne.s32.totalorder %v4288_v14, 0  ;;  %v1440_v36 = vsel %vm3710_vm15, 1, %v4061_v15  ;;  %v714_v18 = vadd.f32 %v713_v9, %v712_v41  ;;  %v4313_v14 = vld [vmem:[#allocation16_spill] sm:$0xff] }
 0x279   :  { %v1752_v25 = vadd.f32 %v1751_v7, %v1745_v10  ;;  %v1492_v52 = vadd.f32 %v1491_v62, %v1485_v56  ;;  %v1232_v35 = vadd.f32 %v1231_v31, %v1225_v12  ;;  %v973_v45 = vsel %vm3728_vm0, %v971_v11, 0.0 }
 0x27a   :  { %v2006_v29 = vsel %vm3632_vm13, %v3091_v37, 0.0  ;;  %v1746_v33 = vsel %vm3642_vm4, %v3194_v39, 0.0  ;;  %v1486_v27 = vsel %vm3649_vm6, %v3311_v16, 0.0  ;;  %v1226_v42 = vsel %vm3747_vm7, %v3435_v61, 0.0  ;;  %v4295_v37 = vld [vmem:[#allocation32_spill] sm:$0xff] }
 0x27b   :  { %v1726_v21 = vrot.slane %v3326_v32, %v2286_v4  ;;  %vm3775_vm10 = vcmp.eq.s32.totalorder %v1468_v49, 1  ;;  %v1946_v59 = vcombine.high %v4295_v37, %v4295_v37  ;;  %v1472_v24 = vrot.slane %v1440_v36, %v2286_v4  ;;  %v2166_v36 = vld [vmem:[#allocation2 + $0x18] sm:$0xff] }
 0x27c   :  { %v1701_v5 = vsel %vm3743_vm5, 1, %v4061_v15  ;;  %v975_v58 = vsel %vm3622_vm9, %v2165_v20, 0.0  ;;  %vm3787_vm13 = vcmp.ne.s32.totalorder %v1686_v17, 0  ;;  %v974_v32 = vadd.f32 %v973_v45, %v714_v18 }
 0x27d   :  { %v2013_v13 = vadd.f32 %v2006_v29, %v2005_v40  ;;  %v1753_v47 = vadd.f32 %v1752_v25, %v1746_v33  ;;  %v1493_v9 = vadd.f32 %v1492_v52, %v1486_v27  ;;  %v1233_v34 = vadd.f32 %v1232_v35, %v1226_v42  ;;  %v4319_v27 = vld [vmem:[#allocation26_spill] sm:$0xff]  ;;  %v4321_v42 = vld [vmem:[#allocation20_spill] sm:$0xff] }
 0x27e   :  { %v2007_v22 = vsel %vm3681_vm3, %v3142_v60, 0.0  ;;  %v4298_v46 = vrot.slane %v3185_v54, %v2286_v4  ;;  %v1747_v3 = vsel %vm3688_vm1, %v3252_v6, 0.0  ;;  %v1487_v50 = vsel %vm3775_vm10, %v3376_v28, 0.0  ;;  %v2118_v60 = vld [vmem:[%s3965_s1 + $0x7] ss:$0 sm:$0xff]  ;;  %v2168_v40 = vld [vmem:[#allocation2 + $0x28] sm:$0xff] }
 0x27f   :  { %vm4302_vm9 = vcmp.eq.s32.totalorder %v2282_v2, %v4301_v23  ;;  %vm4304_vm6 = vnez %v4303_v43  ;;  %vm3816_vm12 = vcmp.eq.s32.totalorder %v1726_v21, 1  ;;  %v1962_v44 = vsel %vm1954_vm14, 1, %v4061_v15  ;;  %s2222_s1 = smov [#allocation5]  }
 0x280   :  { %vm3797_vm4 = vcmp.eq.s32.totalorder %v4298_v46, 1  ;;  %vm3812_vm3 = vmand %vm4304_vm6, %vm4302_vm9  ;;  %v1730_v41 = vrot.slane %v1701_v5, %v2286_v4  ;;  %vm3824_vm1 = vcmp.eq.s32.totalorder %v1472_v24, 1  ;;  %vm3828_vm15 = vcmp.ne.s32.totalorder %v1946_v59, 0  ;;  %s2102_s30 = sshll.u32 %s2222_s1, 4  ;;  %s2103_s30 = int_to_ptr.vmem [resolvable:$true] %s2102_s30 }
 0x281   :  { %v1702_v31 = vsel %vm3787_vm13, 1, %v4061_v15  ;;  %v1948_v11 = vcombine.high %v4274_v19, %v4274_v19  ;;  %v976_v57 = vadd.f32 %v975_v58, %v974_v32  ;;  %v2014_v10 = vadd.f32 %v2013_v13, %v2007_v22  ;;  %v2159_v1 = vpop.eup %2158  ;;  %v4329_v58 = vld [vmem:[#allocation34_spill] sm:$0xff]  ;;  %v4333_v32 = vld [vmem:[#allocation28_spill] sm:$0xff]  ;;  %s2191_s9 = scalar_lea.vmem %s2103_s30, 16  ;;  %s2195_s10 = scalar_lea.vmem %s2103_s30, 32 }
 0x282   :  { %v1754_v56 = vadd.f32 %v1753_v47, %v1747_v3  ;;  %v1494_v12 = vadd.f32 %v1493_v9, %v1487_v50  ;;  %v1235_v55 = vsel %vm3812_vm3, %v1233_v34, 0.0  ;;  %v2008_v63 = vsel %vm3735_vm11, %v3194_v39, 0.0  ;;  %v4334_v34 = vld [vmem:[#allocation41_spill] sm:$0xff]  ;;  %v4335_v50 = vld [vmem:[#allocation38_spill] sm:$0xff]  ;;  %p2192_p8 = scmp.ne.s32.totalorder %s2103_s30, %s2191_s9  ;;  %p2196_p9 = scmp.lt.s32.totalorder %s2103_s30, %s2103_s30 }
 0x283   :  { %v1988_v48 = vrot.slane %v1962_v44, %v2286_v4  ;;  %v1748_v49 = vsel %vm3816_vm12, %v3311_v16, 0.0  ;;  %v1488_v19 = vsel %vm3824_vm1, %v3435_v61, 0.0  ;;  %v1887_v8 = vadd.f32 %v4314_v0, %v4313_v14  ;;  %p2197_p10 = scmp.lt.s32.totalorder %s2195_s10, %s2191_s9 }
 0x284   :  { %v1889_v17 = vmul.f32 0.6931472, %v2159_v1  ;;  %vm3851_vm14 = vcmp.eq.s32.totalorder %v1730_v41, 1  ;;  %v1734_v39 = vrot.slane %v1702_v31, %v2286_v4  ;;  %v1963_v26 = vsel %vm3828_vm15, 1, %v4061_v15 }
 0x285   :  { %v1237_v18 = vsel %vm3728_vm0, %v2166_v36, 0.0  ;;  %vm3861_vm2 = vcmp.ne.s32.totalorder %v1948_v11, 0  ;;  %v1236_v52 = vadd.f32 %v1235_v55, %v976_v57  ;;  %v2015_v45 = vadd.f32 %v2014_v10, %v2008_v63  ;;  %v2167_v11 = vld [vmem:[#allocation2 + $0x20] sm:$0xff]  ;;  %p2198_p11 = por %p2197_p10, %p2196_p9 }
 0x286   :  { %v1890_v35 = vadd.f32 %v1889_v17, %v1887_v8  ;;  %v1755_v29 = vadd.f32 %v1754_v56, %v1748_v49  ;;  %v1495_v33 = vadd.f32 %v1494_v12, %v1488_v19  ;;  %vm4320_vm8 = vcmp.eq.s32.totalorder %v2282_v2, %v4319_v27  ;;  %v4338_v10 = vld [vmem:[#allocation27_spill] sm:$0xff] }
 0x287   :  { %vm4322_vm11 = vnez %v4321_v42  ;;  %v2009_v53 = vsel %vm3797_vm4, %v3252_v6, 0.0  ;;  %v1749_v37 = vsel %vm3851_vm14, %v3376_v28, 0.0  ;;  %vm3880_vm0 = vcmp.eq.s32.totalorder %v1988_v48, 1  ;;  %v4340_v56 = vld [vmem:[#allocation35_spill] sm:$0xff]  ;;  %p2199_p12 = pnand %p2198_p11, %p2192_p8 }
 0x288   :  { %vm3870_vm5 = vmand %vm4322_vm11, %vm4320_vm8  ;;  %v1891_v59 = vadd.f32 %v1890_v35, %v1764_v38  ;;  %v1992_v5 = vrot.slane %v1963_v26, %v2286_v4  ;;  %vm3885_vm7 = vcmp.eq.s32.totalorder %v1734_v39, 1  ;;  %v4330_v30 = vrot.slane %v4329_v58, %v2286_v4 }
 0x289   :  { %v2064_v13 = vrot.slane %v4333_v32, 2  ;;  %v1964_v47 = vsel %vm3861_vm2, 1, %v4061_v15  ;;  %v1238_v9 = vadd.f32 %v1237_v18, %v1236_v52  ;;  %v2016_v46 = vadd.f32 %v2015_v45, %v2009_v53 }
 0x28a   :  { %vm3892_vm10 = vcmp.eq.s32.totalorder %v4330_v30, 1  ;;  %v1756_v51 = vadd.f32 %v1755_v29, %v1749_v37  ;;  %v1497_v3 = vsel %vm3870_vm5, %v1495_v33, 0.0  ;;  %v2010_v43 = vsel %vm3880_vm0, %v3311_v16, 0.0  ;;  %v4344_v33 = vld [vmem:[#allocation39_spill] sm:$0xff] }
 0x28b   :  { %v1898_v22 = vsel %vm3892_vm10, %v1891_v59, %v4334_v34  ;;  %v1750_v15 = vsel %vm3885_vm7, %v3435_v61, 0.0  ;;  %vm3912_vm13 = vcmp.eq.s32.totalorder %v1992_v5, 1  ;;  %v1996_v44 = vrot.slane %v1964_v47, %v2286_v4 }
 0x28c   :  { %v2030_v23 = vadd.f32 %v4335_v50, %v1898_v22  ;;  %v2065_v41 = vadd.f32 %v2064_v13, %v4333_v32  ;;  %v1498_v62 = vadd.f32 %v1497_v3, %v1238_v9  ;;  %v2017_v31 = vadd.f32 %v2016_v46, %v2010_v43 }
 0x28d   :  { %v1499_v57 = vsel %vm3812_vm3, %v2167_v11, 0.0  ;;  %v1757_v16 = vadd.f32 %v1756_v51, %v1750_v15  ;;  %vm4339_vm4 = vcmp.eq.s32.totalorder %v2282_v2, %v4338_v10  ;;  %vm4341_vm9 = vnez %v4340_v56  ;;  %v4347_v56 = vld [vmem:[#allocation21_spill] sm:$0xff] }
 0x28e   :  { %v2031_v7 = vrot.slane %v2030_v23, 4  ;;  %vm3925_vm6 = vmand %vm4341_vm9, %vm4339_vm4  ;;  %v2011_v55 = vsel %vm3912_vm13, %v3376_v28, 0.0  ;;  %vm2004_vm12 = vcmp.eq.s32.totalorder %v1996_v44, 1  ;;  %v2066_v1 = vrot.slane %v2065_v41, 1 }
 0x28f   :  { %v1500_v48 = vadd.f32 %v1499_v57, %v1498_v62  ;;  %v2018_v49 = vadd.f32 %v2017_v31, %v2011_v55  ;;  %v1759_v19 = vsel %vm3925_vm6, %v1757_v16, 0.0  ;;  %v2012_v0 = vsel %vm2004_vm12, %v3435_v61, 0.0  ;;  %v4345_v62 = vld [vmem:[#allocation29_spill] sm:$0xff] }
 0x290   :  { %v2032_v4 = vmax.f32 %v2030_v23, %v2031_v7  ;;  %vm1772_vm3 = vcmp.eq.s32.totalorder %v2282_v2, %v2118_v60  ;;  %v2067_v8 = vadd.f32 %v2066_v1, %v2065_v41  ;;  %v1761_v39 = vsel %vm3870_vm5, %v2168_v40, 0.0 }
 0x291   :  { %v1760_v28 = vadd.f32 %v1759_v19, %v1500_v48  ;;  %v2019_v26 = vadd.f32 %v2018_v49, %v2012_v0  ;;  %vm2020_vm1 = vmand %vm3892_vm10, %vm1772_vm3  ;;  %v2023_v27 = vsel %vm3925_vm6, %v4344_v33, 0.0  ;;  %vm4346_vm14 = vcmp.ne.f32.partialorder %v4345_v62, 0.0 }
 0x292   :  { %v2033_v63 = vrot.slane %v2032_v4, 2  ;;  %v2122_v18 = vtrunc.f32 %v2067_v8  ;;  %vm4348_vm2 = vcmp.ne.f32.partialorder %v4347_v56, 0.0 }
 0x293   :  { %v1762_v52 = vadd.f32 %v1761_v39, %v1760_v28  ;;  %v2021_v35 = vsel %vm2020_vm1, %v2019_v26, 0.0 }
 0x294   :  { %v2034_v14 = vmax.f32 %v2032_v4, %v2033_v63  ;;  %v2123_v61 = vcvt.f32.s32 %v2122_v18 }
 0x295   :  { %v2022_v29 = vadd.f32 %v2021_v35, %v1762_v52 }
 0x296   :  { %v2035_v17 = vrot.slane %v2034_v14, 1  ;;  %vm2069_vm15 = vcmp.eq.s32.totalorder %v2282_v2, %v2123_v61 }
 0x297   :  { %v2024_v42 = vadd.f32 %v2023_v27, %v2022_v29  ;;  %v2077_v21 = vsel %vm2069_vm15, %v1764_v38, 0.0  ;;  %v2070_v53 = vsel %vm2069_vm15, %v4335_v50, 0.0 }
 0x298   :  { %v2036_v36 = vmax.f32 %v2034_v14, %v2035_v17  ;;  %v2078_v59 = vrot.slane %v2077_v21, 4  ;;  %v2071_v5 = vrot.slane %v2070_v53, 4 }
 0x299   :  { %v2084_v37 = vrot.slane %v2024_v42, 4 }
 0x29a   :  { %v2037_v25 = vsub.f32 %v2030_v23, %v2036_v36  ;;  %v2079_v30 = vadd.f32 %v2078_v59, %v2077_v21  ;;  %v2072_v32 = vadd.f32 %v2071_v5, %v2070_v53 }
 0x29b   :  { %v2085_v58 = vadd.f32 %v2084_v37, %v2024_v42 }
 0x29c   :  { %v2038_v45 = vmul.f32 1.442695, %v2037_v25  ;;  %v2080_v9 = vrot.slane %v2079_v30, 2  ;;  %v2073_v22 = vrot.slane %v2072_v32, 2 }
 0x29d   :  { %v2086_v47 = vrot.slane %v2085_v58, 2 }
 0x29e   :  { %2160 = vpow2.f32 %v2038_v45  ;;  %v2081_v51 = vadd.f32 %v2080_v9, %v2079_v30  ;;  %v2074_v3 = vadd.f32 %v2073_v22, %v2072_v32 }
 0x29f   :  { %v2087_v2 = vadd.f32 %v2086_v47, %v2085_v58 }
 0x2a0   :  { %v2082_v23 = vrot.slane %v2081_v51, 1  ;;  %v2075_v43 = vrot.slane %v2074_v3, 1 }
 0x2a1   :  { %v2088_v50 = vrot.slane %v2087_v2, 1 }
 0x2a2   :  { %v2083_v54 = vadd.f32 %v2082_v23, %v2081_v51  ;;  %v2076_v44 = vadd.f32 %v2075_v43, %v2074_v3 }
 0x2a3   :  { %v2089_v15 = vadd.f32 %v2088_v50, %v2087_v2 }
 0x2a4   :  { %v2091_v31 = vsel %vm4346_vm14, %v2083_v54, 0.0 }
 0x2a5   :  { %v2090_v41 = vadd.f32 %v2089_v15, %v2076_v44 }
 0x2a7   :  { %v2092_v16 = vadd.f32 %v2091_v31, %v2090_v41 }
 0x2a8   :  { %v2161_v24 = vpop.eup %2160 }
 0x2a9   :  { %v2040_v20 = vrot.slane %v2161_v24, 4 }
 0x2ab   :  { %v2041_v6 = vadd.f32 %v2161_v24, %v2040_v20 }
 0x2ad   :  { %v2042_v13 = vrot.slane %v2041_v6, 2 }
 0x2af   :  { %v2043_v34 = vadd.f32 %v2042_v13, %v2041_v6 }
 0x2b1   :  { %v2044_v46 = vrot.slane %v2043_v34, 1 }
 0x2b3   :  { %v2045_v38 = vadd.f32 %v2044_v46, %v2043_v34 }
 0x2b5   :  { %2162 = vlog2.f32 %v2045_v38 }
 0x2bf   :  { %v2163_v7 = vpop.eup %2162 }
 0x2c0   :  { %v2047_v11 = vmul.f32 0.6931472, %v2163_v7 }
 0x2c2   :  { %v2048_v57 = vadd.f32 %v2047_v11, %v2036_v36 }
 0x2c4   :  { %v2093_v10 = vsub.f32 %v2092_v16, %v2048_v57 }
 0x2c6   :  { %v2094_v12 = vsel %vm4348_vm2, %v2093_v10, 0.0 }
 0x2c7   :  { %2095 = vst [vmem:[#allocation5] sm:$0x1] %v2094_v12 }
 0x2c8   :  { %2202 = shalt.err (!%p2199_p12)
}
 0x2c9   :  { %s2203_s13 = scalar_lea.hbm %s3972_s8, 16 }
 0x2ca   :  { %p2204_p13 = scmp.ne.s32.totalorder %s3972_s8, %s2203_s13  ;;  %p2207_p0 = scmp.lt.u32.totalorder %s2203_s13, %s3972_s8 }
 0x2cc   :  { %p2209_p1 = pnand %p2207_p0, %p2204_p13 }
 0x2ce   :  { %2212 = shalt.err (!%p2209_p1)
}
 0x2cf   :  { %2105 = dma.vmem_to_hbm [thread:$0]  %s2103_s30, 16, %s3972_s8, [#allocation4]  }
 0x2d0   :  { %2215 = dma.done.wait [#allocation4], 16  }
 0x2d1   :  { %2216 = vsyncadd [#allocation4], 4294967280 }
 0x2d2   :  { %2109 = vsyncpa [#allocation3], 1 }
 0x2d3   :  { %2110 = vsyncpa [#allocation4], 1 }

</bundles_post_ra>
